<compile_context>
chip_gen: v5e
topology: v5e:2x2
jax: 0.10.0
libtpu: 0.0.40
codegen_flags: <defaults>
</compile_context>

<pallas_src>
import functools
import math

import jax
import jax.numpy as jnp
from jax import lax
from jax.experimental import pallas as pl
from jax.experimental.pallas import tpu as pltpu


def _round_up(x, m):
    return ((x + m - 1) // m) * m


def gru_chunk_kernel(x_ref, wih_ref, whh_ref, bfused_ref, bhn_ref, wout_ref, bout_ref,
                     y_ref, hn_ref,
                     gi_ref, hall_ref, hcarry_ref,
                     *, chunk_t, bp, hp, t_real, needs_mask, unroll):
    """One time-chunk of the GRU recurrence + hoisted projections.

    x_ref     : (chunk_t*bp, I)     f32  flattened time-major padded input chunk
    wih_ref   : (I, 3*hp)           f32  per-gate padded, transposed W_ih
    whh_ref   : (hp, 3*hp)          f32  per-gate padded, transposed W_hh
    bfused_ref: (1, 3*hp)           f32  b_ih (all gates) + b_hh (r,z gates)
    bhn_ref   : (1, hp)             f32  b_hh (n gate), must stay inside r*(...)
    wout_ref  : (hp, op)            f32
    bout_ref  : (1, op)             f32
    y_ref     : (chunk_t*bp, op)    f32  output chunk (streamed)
    hn_ref    : (bp, hp)            f32  final hidden state (resident output)
    gi_ref    : (chunk_t*bp, 3*hp)  f32  scratch: hoisted input projection
    hall_ref  : (chunk_t*bp, hp)    f32  scratch: per-step hidden states of the chunk
    hcarry_ref: (bp, hp)            f32  scratch: hidden state carried across chunks
    """
    c = pl.program_id(0)

    @pl.when(c == 0)
    def _():
        # h_0 = zeros (PyTorch default when no initial hidden state is given).
        hcarry_ref[...] = jnp.zeros_like(hcarry_ref)

    # ---- Hoisted input projection for the whole chunk: one large MXU matmul. ----
    gi_ref[...] = (
        jnp.dot(x_ref[...], wih_ref[...], preferred_element_type=jnp.float32)
        + bfused_ref[...]
    )

    whh = whh_ref[...]
    b_hn = bhn_ref[...]

    def step(t, h_prev):
        row = pl.multiple_of(t * bp, bp)
        gi = gi_ref[pl.ds(row, bp), :]                                     # (bp, 3*hp)
        gh = jnp.dot(h_prev, whh, preferred_element_type=jnp.float32)      # (bp, 3*hp)

        r = jax.nn.sigmoid(gi[:, 0:hp] + gh[:, 0:hp])
        z = jax.nn.sigmoid(gi[:, hp:2 * hp] + gh[:, hp:2 * hp])
        n = jnp.tanh(gi[:, 2 * hp:3 * hp] + r * (gh[:, 2 * hp:3 * hp] + b_hn))
        h_new = (1.0 - z) * n + z * h_prev

        if needs_mask:
            valid = (c * chunk_t + t) < t_real
            h_new = jnp.where(valid, h_new, h_prev)      # freeze h on padded timesteps

        hall_ref[pl.ds(row, bp), :] = h_new
        return h_new

    h_last = lax.fori_loop(0, chunk_t, step, hcarry_ref[...], unroll=unroll)
    hcarry_ref[...] = h_last
    hn_ref[...] = h_last

    # ---- Hoisted output Linear over the whole chunk: one large MXU matmul. ----
    y_ref[...] = (
        jnp.dot(hall_ref[...], wout_ref[...], preferred_element_type=jnp.float32)
        + bout_ref[...]
    ).astype(y_ref.dtype)


@jax.jit
def gru_model_forward(x, w_ih, w_hh, b_ih, b_hh, w_out, b_out):
    """x: (B, T, I) float32. Returns (y: (B, T, O), hidden: (1, B, H))."""
    B, T, I = x.shape
    H = w_hh.shape[1]
    O = w_out.shape[0]

    HP = _round_up(H, 128)          # lane-dense hidden width
    OP = _round_up(O, 128)          # lane-dense output width
    BP = _round_up(B, 8)            # sublane-dense batch
    CHUNK_T = min(T, 64)            # time-chunk streamed over the grid
    TP = _round_up(T, CHUNK_T)
    n_chunks = TP // CHUNK_T
    needs_mask = (TP != T)
    unroll = True if CHUNK_T <= 16 else 8

    f32 = jnp.float32

    # ---- pack / pad weights (PyTorch layouts -> lane-dense per-gate padded) ----
    def pack_gates_w(w, k):          # w: (3H, k) -> (k, 3*HP); per-gate transposed blocks
        out = jnp.zeros((k, 3 * HP), f32)
        for g in range(3):
            out = out.at[:, g * HP:g * HP + H].set(w[g * H:(g + 1) * H, :].T.astype(f32))
        return out

    def pack_gates_b(b):             # (3H,) -> (1, 3*HP)
        out = jnp.zeros((1, 3 * HP), f32)
        for g in range(3):
            out = out.at[0, g * HP:g * HP + H].set(b[g * H:(g + 1) * H].astype(f32))
        return out

    wih_p = pack_gates_w(w_ih, I)                                           # (I, 3HP)
    whh_p = jnp.zeros((HP, 3 * HP), f32).at[:H].set(pack_gates_w(w_hh, H))  # (HP, 3HP)
    b_ih_p = pack_gates_b(b_ih)
    b_hh_p = pack_gates_b(b_hh)
    b_fused = b_ih_p.at[:, :2 * HP].add(b_hh_p[:, :2 * HP])                 # fuse r,z hh-bias
    b_hn = b_hh_p[:, 2 * HP:3 * HP]                                         # (1, HP)
    wout_p = jnp.zeros((HP, OP), f32).at[:H, :O].set(w_out.T.astype(f32))
    bout_p = jnp.zeros((1, OP), f32).at[0, :O].set(b_out.astype(f32))

    # ---- time-major, batch/time padded, flattened input ----
    x_tm = jnp.transpose(x.astype(f32), (1, 0, 2))                          # (T, B, I)
    x_p = jnp.zeros((TP, BP, I), f32).at[:T, :B].set(x_tm)
    x2d = x_p.reshape(TP * BP, I)

    kernel = functools.partial(
        gru_chunk_kernel, chunk_t=CHUNK_T, bp=BP, hp=HP,
        t_real=T, needs_mask=needs_mask, unroll=unroll)

    def _nbytes(shape):
        return 4 * math.prod(shape)

    vmem_bytes = (
        2 * _nbytes((CHUNK_T * BP, I))                  # x chunk (double-buffered)
        + 2 * _nbytes((CHUNK_T * BP, OP))               # y chunk
        + 2 * _nbytes((BP, HP))                         # h_n output
        + 2 * (_nbytes((I, 3 * HP)) + _nbytes((HP, 3 * HP)) + _nbytes((1, 3 * HP))
               + _nbytes((1, HP)) + _nbytes((HP, OP)) + _nbytes((1, OP)))
        + _nbytes((CHUNK_T * BP, 3 * HP))               # gi scratch
        + _nbytes((CHUNK_T * BP, HP))                   # h_all scratch
        + _nbytes((BP, HP))                             # h carry scratch
    )
    vmem_limit = int(min(max(2 * vmem_bytes, 8 << 20), 64 << 20))

    cost = pl.CostEstimate(
        flops=int(2 * TP * BP * (I * 3 * HP + HP * 3 * HP + HP * OP) + 10 * TP * BP * HP),
        transcendentals=int(3 * TP * BP * HP),
        bytes_accessed=int(
            _nbytes((TP * BP, I)) + _nbytes((TP * BP, OP)) + _nbytes((BP, HP))
            + _nbytes((I, 3 * HP)) + _nbytes((HP, 3 * HP)) + _nbytes((HP, OP))),
    )

    grid_spec = pltpu.PrefetchScalarGridSpec(
        num_scalar_prefetch=0,
        grid=(n_chunks,),
        in_specs=[
            pl.BlockSpec((CHUNK_T * BP, I), lambda c: (c, 0)),      # x chunk (streamed)
            pl.BlockSpec((I, 3 * HP), lambda c: (0, 0)),            # W_ih (resident)
            pl.BlockSpec((HP, 3 * HP), lambda c: (0, 0)),           # W_hh (resident)
            pl.BlockSpec((1, 3 * HP), lambda c: (0, 0)),            # fused bias
            pl.BlockSpec((1, HP), lambda c: (0, 0)),                # b_hh (n gate)
            pl.BlockSpec((HP, OP), lambda c: (0, 0)),               # W_out (resident)
            pl.BlockSpec((1, OP), lambda c: (0, 0)),                # b_out
        ],
        out_specs=(
            pl.BlockSpec((CHUNK_T * BP, OP), lambda c: (c, 0)),     # y chunk (streamed)
            pl.BlockSpec((BP, HP), lambda c: (0, 0)),               # h_n (resident)
        ),
        scratch_shapes=[
            pltpu.VMEM((CHUNK_T * BP, 3 * HP), jnp.float32),        # hoisted gi
            pltpu.VMEM((CHUNK_T * BP, HP), jnp.float32),            # per-step hidden states
            pltpu.VMEM((BP, HP), jnp.float32),                      # carried hidden state
        ],
    )

    y2d, hn = pl.pallas_call(
        kernel,
        out_shape=(jax.ShapeDtypeStruct((TP * BP, OP), jnp.float32),
                   jax.ShapeDtypeStruct((BP, HP), jnp.float32)),
        grid_spec=grid_spec,
        compiler_params=pltpu.CompilerParams(
            dimension_semantics=("arbitrary",),     # time recurrence is serial
            vmem_limit_bytes=vmem_limit),
        cost_estimate=cost,
    )(x2d, wih_p, whh_p, b_fused, b_hn, wout_p, bout_p)

    y = jnp.transpose(y2d.reshape(TP, BP, OP)[:T, :B, :O], (1, 0, 2))       # (B, T, O)
    hidden = hn[:B, :H][None]                                               # (1, B, H)
    return y, hidden


def gru_model_reference(x, w_ih, w_hh, b_ih, b_hh, w_out, b_out):
    """Pure-JAX reference mirroring torch.nn.GRU + nn.Linear semantics."""
    B, T, I = x.shape
    H = w_hh.shape[1]

    def cell(h, x_t):
        gi = x_t @ w_ih.T + b_ih
        gh = h @ w_hh.T + b_hh
        i_r, i_z, i_n = gi[:, :H], gi[:, H:2 * H], gi[:, 2 * H:]
        h_r, h_z, h_n = gh[:, :H], gh[:, H:2 * H], gh[:, 2 * H:]
        r = jax.nn.sigmoid(i_r + h_r)
        z = jax.nn.sigmoid(i_z + h_z)
        n = jnp.tanh(i_n + r * h_n)
        h_new = (1.0 - z) * n + z * h
        return h_new, h_new

    h0 = jnp.zeros((B, H), jnp.float32)
    h_last, hs = lax.scan(cell, h0, jnp.transpose(x, (1, 0, 2)))
    hs = jnp.transpose(hs, (1, 0, 2))                                       # (B, T, H)
    y = hs @ w_out.T + b_out
    return y, h_last[None]


if __name__ == "__main__":
    # Small shapes consistent with GRUModel(input_num, hidden_num, output_num)
    B, T = 2, 8
    INPUT_NUM, HIDDEN_NUM, OUTPUT_NUM = 4, 32, 16

    key = jax.random.PRNGKey(0)
    ks = jax.random.split(key, 8)

    # Deterministic parameter init (PyTorch-style uniform(-1/sqrt(H), 1/sqrt(H))).
    bound = 1.0 / (HIDDEN_NUM ** 0.5)
    w_ih = jax.random.uniform(ks[0], (3 * HIDDEN_NUM, INPUT_NUM), jnp.float32, -bound, bound)
    w_hh = jax.random.uniform(ks[1], (3 * HIDDEN_NUM, HIDDEN_NUM), jnp.float32, -bound, bound)
    b_ih = jax.random.uniform(ks[2], (3 * HIDDEN_NUM,), jnp.float32, -bound, bound)
    b_hh = jax.random.uniform(ks[3], (3 * HIDDEN_NUM,), jnp.float32, -bound, bound)
    w_out = jax.random.uniform(ks[4], (OUTPUT_NUM, HIDDEN_NUM), jnp.float32, -bound, bound)
    b_out = jax.random.uniform(ks[5], (OUTPUT_NUM,), jnp.float32, -bound, bound)

    x = jax.random.normal(ks[6], (B, T, INPUT_NUM), jnp.float32)

    y, hidden = gru_model_forward(x, w_ih, w_hh, b_ih, b_hh, w_out, b_out)
    jax.block_until_ready((y, hidden))

    y_ref, hidden_ref = gru_model_reference(x, w_ih, w_hh, b_ih, b_hh, w_out, b_out)
    assert y.shape == (B, T, OUTPUT_NUM)
    assert hidden.shape == (1, B, HIDDEN_NUM)
    assert jnp.allclose(y, y_ref, atol=1e-5, rtol=1e-5)
    assert jnp.allclose(hidden, hidden_ref, atol=1e-5, rtol=1e-5)

    print("KERNEL_OK")
</pallas_src>

<mosaic_0001>
module attributes {stable_mosaic.version = 11 : i64} {
  func.func @gru_chunk_kernel(%arg0: i32, %arg1: memref<64x4xf32, #tpu.memory_space<vmem>>, %arg2: memref<4x384xf32, #tpu.memory_space<vmem>>, %arg3: memref<128x384xf32, #tpu.memory_space<vmem>>, %arg4: memref<1x384xf32, #tpu.memory_space<vmem>>, %arg5: memref<1x128xf32, #tpu.memory_space<vmem>>, %arg6: memref<128x128xf32, #tpu.memory_space<vmem>>, %arg7: memref<1x128xf32, #tpu.memory_space<vmem>>, %arg8: memref<64x128xf32, #tpu.memory_space<vmem>>, %arg9: memref<8x128xf32, #tpu.memory_space<vmem>>, %arg10: memref<64x384xf32, #tpu.memory_space<vmem>>, %arg11: memref<64x128xf32, #tpu.memory_space<vmem>>, %arg12: memref<8x128xf32, #tpu.memory_space<vmem>>) attributes {dimension_semantics = [#tpu.dimension_semantics<arbitrary>], iteration_bounds = array<i64: 1>, scalar_prefetch = 0 : i64, scratch_operands = 3 : i64, tpu.core_type = #tpu.core_type<tc>, window_params = [{transform_indices = @transform_0, window_bounds = array<i64: 64, 4>}, {pipeline_mode = #tpu.pipeline_mode<synchronous>, transform_indices = @transform_1, window_bounds = array<i64: 4, 384>}, {pipeline_mode = #tpu.pipeline_mode<synchronous>, transform_indices = @transform_2, window_bounds = array<i64: 128, 384>}, {pipeline_mode = #tpu.pipeline_mode<synchronous>, transform_indices = @transform_3, window_bounds = array<i64: 1, 384>}, {pipeline_mode = #tpu.pipeline_mode<synchronous>, transform_indices = @transform_4, window_bounds = array<i64: 1, 128>}, {pipeline_mode = #tpu.pipeline_mode<synchronous>, transform_indices = @transform_5, window_bounds = array<i64: 128, 128>}, {pipeline_mode = #tpu.pipeline_mode<synchronous>, transform_indices = @transform_6, window_bounds = array<i64: 1, 128>}, {transform_indices = @transform_7, window_bounds = array<i64: 64, 128>}, {pipeline_mode = #tpu.pipeline_mode<synchronous>, transform_indices = @transform_8, window_bounds = array<i64: 8, 128>}]} {
    %c0_i32 = arith.constant 0 : i32
    %0 = arith.cmpi eq, %arg0, %c0_i32 : i32
    %1 = arith.extui %0 : i1 to i32
    %c0_i32_0 = arith.constant 0 : i32
    %2 = arith.cmpi ne, %1, %c0_i32_0 : i32
    scf.if %2 {
      %cst_84 = arith.constant 0.000000e+00 : f32
      %302 = vector.broadcast %cst_84 : f32 to vector<8x128xf32>
      %c0_85 = arith.constant 0 : index
      %c0_86 = arith.constant 0 : index
      %303 = vector.load %arg12[%c0_85, %c0_86] : memref<8x128xf32, #tpu.memory_space<vmem>>, vector<8x128xf32>
      tpu.vector_store %arg12[%c0_85, %c0_86], %302 {strides = array<i32>} : memref<8x128xf32, #tpu.memory_space<vmem>>, vector<8x128xf32>,
    } else {
    }
    %c0 = arith.constant 0 : index
    %c0_1 = arith.constant 0 : index
    %3 = vector.load %arg1[%c0, %c0_1] : memref<64x4xf32, #tpu.memory_space<vmem>>, vector<64x4xf32>
    %c0_2 = arith.constant 0 : index
    %c0_3 = arith.constant 0 : index
    %4 = vector.load %arg2[%c0_2, %c0_3] : memref<4x384xf32, #tpu.memory_space<vmem>>, vector<4x384xf32>
    %cst = arith.constant dense<0.000000e+00> : vector<64x384xf32>
    %5 = tpu.matmul %3, %4, %cst {dimension_numbers = #tpu.dot_dimension_numbers<[1], [0], [0], [1], [0, 0, 1, 1], [], []>} : vector<64x4xf32>, vector<4x384xf32>, vector<64x384xf32> -> vector<64x384xf32>
    %c0_4 = arith.constant 0 : index
    %c0_5 = arith.constant 0 : index
    %6 = vector.load %arg4[%c0_4, %c0_5] : memref<1x384xf32, #tpu.memory_space<vmem>>, vector<1x384xf32>
    %7 = vector.broadcast %6 : vector<1x384xf32> to vector<64x384xf32>
    %8 = arith.addf %5, %7 : vector<64x384xf32>
    %c0_6 = arith.constant 0 : index
    %c0_7 = arith.constant 0 : index
    %9 = vector.load %arg10[%c0_6, %c0_7] : memref<64x384xf32, #tpu.memory_space<vmem>>, vector<64x384xf32>
    tpu.vector_store %arg10[%c0_6, %c0_7], %8 {strides = array<i32>} : memref<64x384xf32, #tpu.memory_space<vmem>>, vector<64x384xf32>,
    %c0_8 = arith.constant 0 : index
    %c0_9 = arith.constant 0 : index
    %10 = vector.load %arg3[%c0_8, %c0_9] : memref<128x384xf32, #tpu.memory_space<vmem>>, vector<128x384xf32>
    %c0_10 = arith.constant 0 : index
    %c0_11 = arith.constant 0 : index
    %11 = vector.load %arg5[%c0_10, %c0_11] : memref<1x128xf32, #tpu.memory_space<vmem>>, vector<1x128xf32>
    %c0_12 = arith.constant 0 : index
    %c0_13 = arith.constant 0 : index
    %12 = vector.load %arg12[%c0_12, %c0_13] : memref<8x128xf32, #tpu.memory_space<vmem>>, vector<8x128xf32>
    %c0_i32_14 = arith.constant 0 : i32
    %c8_i32 = arith.constant 8 : i32
    %13 = arith.muli %c0_i32_14, %c8_i32 : i32
    %14 = tpu.assume_multiple %13, 8 : i32
    %15 = arith.index_cast %14 : i32 to index
    %c0_15 = arith.constant 0 : index
    %16 = vector.load %arg10[%15, %c0_15] : memref<64x384xf32, #tpu.memory_space<vmem>>, vector<8x384xf32>
    %cst_16 = arith.constant dense<0.000000e+00> : vector<8x384xf32>
    %17 = tpu.matmul %12, %10, %cst_16 {dimension_numbers = #tpu.dot_dimension_numbers<[1], [0], [0], [1], [0, 0, 1, 1], [], []>} : vector<8x128xf32>, vector<128x384xf32>, vector<8x384xf32> -> vector<8x384xf32>
    %18 = vector.extract_strided_slice %16 {offsets = [0, 0], sizes = [8, 128], strides = [1, 1]} : vector<8x384xf32> to vector<8x128xf32>
    %19 = vector.extract_strided_slice %17 {offsets = [0, 0], sizes = [8, 128], strides = [1, 1]} : vector<8x384xf32> to vector<8x128xf32>
    %20 = arith.addf %18, %19 : vector<8x128xf32>
    %21 = arith.negf %20 : vector<8x128xf32>
    %22 = math.exp %21 : vector<8x128xf32>
    %cst_17 = arith.constant 1.000000e+00 : f32
    %23 = vector.broadcast %cst_17 : f32 to vector<8x128xf32>
    %24 = arith.addf %23, %22 : vector<8x128xf32>
    %25 = arith.divf %23, %24 : vector<8x128xf32>
    %26 = vector.extract_strided_slice %16 {offsets = [0, 128], sizes = [8, 128], strides = [1, 1]} : vector<8x384xf32> to vector<8x128xf32>
    %27 = vector.extract_strided_slice %17 {offsets = [0, 128], sizes = [8, 128], strides = [1, 1]} : vector<8x384xf32> to vector<8x128xf32>
    %28 = arith.addf %26, %27 : vector<8x128xf32>
    %29 = arith.negf %28 : vector<8x128xf32>
    %30 = math.exp %29 : vector<8x128xf32>
    %cst_18 = arith.constant 1.000000e+00 : f32
    %31 = vector.broadcast %cst_18 : f32 to vector<8x128xf32>
    %32 = arith.addf %31, %30 : vector<8x128xf32>
    %33 = arith.divf %31, %32 : vector<8x128xf32>
    %34 = vector.extract_strided_slice %16 {offsets = [0, 256], sizes = [8, 128], strides = [1, 1]} : vector<8x384xf32> to vector<8x128xf32>
    %35 = vector.extract_strided_slice %17 {offsets = [0, 256], sizes = [8, 128], strides = [1, 1]} : vector<8x384xf32> to vector<8x128xf32>
    %36 = vector.broadcast %11 : vector<1x128xf32> to vector<8x128xf32>
    %37 = arith.addf %35, %36 : vector<8x128xf32>
    %38 = arith.mulf %25, %37 : vector<8x128xf32>
    %39 = arith.addf %34, %38 : vector<8x128xf32>
    %40 = math.tanh %39 : vector<8x128xf32>
    %cst_19 = arith.constant 1.000000e+00 : f32
    %41 = vector.broadcast %cst_19 : f32 to vector<8x128xf32>
    %42 = arith.subf %41, %33 : vector<8x128xf32>
    %43 = arith.mulf %42, %40 : vector<8x128xf32>
    %44 = arith.mulf %33, %12 : vector<8x128xf32>
    %45 = arith.addf %43, %44 : vector<8x128xf32>
    %46 = arith.index_cast %14 : i32 to index
    %c0_20 = arith.constant 0 : index
    %47 = vector.load %arg11[%46, %c0_20] : memref<64x128xf32, #tpu.memory_space<vmem>>, vector<8x128xf32>
    tpu.vector_store %arg11[%46, %c0_20], %45 {strides = array<i32>} : memref<64x128xf32, #tpu.memory_space<vmem>>, vector<8x128xf32>,
    %c1_i32 = arith.constant 1 : i32
    %c8_i32_21 = arith.constant 8 : i32
    %48 = arith.muli %c1_i32, %c8_i32_21 : i32
    %49 = tpu.assume_multiple %48, 8 : i32
    %50 = arith.index_cast %49 : i32 to index
    %c0_22 = arith.constant 0 : index
    %51 = vector.load %arg10[%50, %c0_22] : memref<64x384xf32, #tpu.memory_space<vmem>>, vector<8x384xf32>
    %cst_23 = arith.constant dense<0.000000e+00> : vector<8x384xf32>
    %52 = tpu.matmul %45, %10, %cst_23 {dimension_numbers = #tpu.dot_dimension_numbers<[1], [0], [0], [1], [0, 0, 1, 1], [], []>} : vector<8x128xf32>, vector<128x384xf32>, vector<8x384xf32> -> vector<8x384xf32>
    %53 = vector.extract_strided_slice %51 {offsets = [0, 0], sizes = [8, 128], strides = [1, 1]} : vector<8x384xf32> to vector<8x128xf32>
    %54 = vector.extract_strided_slice %52 {offsets = [0, 0], sizes = [8, 128], strides = [1, 1]} : vector<8x384xf32> to vector<8x128xf32>
    %55 = arith.addf %53, %54 : vector<8x128xf32>
    %56 = arith.negf %55 : vector<8x128xf32>
    %57 = math.exp %56 : vector<8x128xf32>
    %cst_24 = arith.constant 1.000000e+00 : f32
    %58 = vector.broadcast %cst_24 : f32 to vector<8x128xf32>
    %59 = arith.addf %58, %57 : vector<8x128xf32>
    %60 = arith.divf %58, %59 : vector<8x128xf32>
    %61 = vector.extract_strided_slice %51 {offsets = [0, 128], sizes = [8, 128], strides = [1, 1]} : vector<8x384xf32> to vector<8x128xf32>
    %62 = vector.extract_strided_slice %52 {offsets = [0, 128], sizes = [8, 128], strides = [1, 1]} : vector<8x384xf32> to vector<8x128xf32>
    %63 = arith.addf %61, %62 : vector<8x128xf32>
    %64 = arith.negf %63 : vector<8x128xf32>
    %65 = math.exp %64 : vector<8x128xf32>
    %cst_25 = arith.constant 1.000000e+00 : f32
    %66 = vector.broadcast %cst_25 : f32 to vector<8x128xf32>
    %67 = arith.addf %66, %65 : vector<8x128xf32>
    %68 = arith.divf %66, %67 : vector<8x128xf32>
    %69 = vector.extract_strided_slice %51 {offsets = [0, 256], sizes = [8, 128], strides = [1, 1]} : vector<8x384xf32> to vector<8x128xf32>
    %70 = vector.extract_strided_slice %52 {offsets = [0, 256], sizes = [8, 128], strides = [1, 1]} : vector<8x384xf32> to vector<8x128xf32>
    %71 = vector.broadcast %11 : vector<1x128xf32> to vector<8x128xf32>
    %72 = arith.addf %70, %71 : vector<8x128xf32>
    %73 = arith.mulf %60, %72 : vector<8x128xf32>
    %74 = arith.addf %69, %73 : vector<8x128xf32>
    %75 = math.tanh %74 : vector<8x128xf32>
    %cst_26 = arith.constant 1.000000e+00 : f32
    %76 = vector.broadcast %cst_26 : f32 to vector<8x128xf32>
    %77 = arith.subf %76, %68 : vector<8x128xf32>
    %78 = arith.mulf %77, %75 : vector<8x128xf32>
    %79 = arith.mulf %68, %45 : vector<8x128xf32>
    %80 = arith.addf %78, %79 : vector<8x128xf32>
    %81 = arith.index_cast %49 : i32 to index
    %c0_27 = arith.constant 0 : index
    %82 = vector.load %arg11[%81, %c0_27] : memref<64x128xf32, #tpu.memory_space<vmem>>, vector<8x128xf32>
    tpu.vector_store %arg11[%81, %c0_27], %80 {strides = array<i32>} : memref<64x128xf32, #tpu.memory_space<vmem>>, vector<8x128xf32>,
    %c2_i32 = arith.constant 2 : i32
    %c8_i32_28 = arith.constant 8 : i32
    %83 = arith.muli %c2_i32, %c8_i32_28 : i32
    %84 = tpu.assume_multiple %83, 8 : i32
    %85 = arith.index_cast %84 : i32 to index
    %c0_29 = arith.constant 0 : index
    %86 = vector.load %arg10[%85, %c0_29] : memref<64x384xf32, #tpu.memory_space<vmem>>, vector<8x384xf32>
    %cst_30 = arith.constant dense<0.000000e+00> : vector<8x384xf32>
    %87 = tpu.matmul %80, %10, %cst_30 {dimension_numbers = #tpu.dot_dimension_numbers<[1], [0], [0], [1], [0, 0, 1, 1], [], []>} : vector<8x128xf32>, vector<128x384xf32>, vector<8x384xf32> -> vector<8x384xf32>
    %88 = vector.extract_strided_slice %86 {offsets = [0, 0], sizes = [8, 128], strides = [1, 1]} : vector<8x384xf32> to vector<8x128xf32>
    %89 = vector.extract_strided_slice %87 {offsets = [0, 0], sizes = [8, 128], strides = [1, 1]} : vector<8x384xf32> to vector<8x128xf32>
    %90 = arith.addf %88, %89 : vector<8x128xf32>
    %91 = arith.negf %90 : vector<8x128xf32>
    %92 = math.exp %91 : vector<8x128xf32>
    %cst_31 = arith.constant 1.000000e+00 : f32
    %93 = vector.broadcast %cst_31 : f32 to vector<8x128xf32>
    %94 = arith.addf %93, %92 : vector<8x128xf32>
    %95 = arith.divf %93, %94 : vector<8x128xf32>
    %96 = vector.extract_strided_slice %86 {offsets = [0, 128], sizes = [8, 128], strides = [1, 1]} : vector<8x384xf32> to vector<8x128xf32>
    %97 = vector.extract_strided_slice %87 {offsets = [0, 128], sizes = [8, 128], strides = [1, 1]} : vector<8x384xf32> to vector<8x128xf32>
    %98 = arith.addf %96, %97 : vector<8x128xf32>
    %99 = arith.negf %98 : vector<8x128xf32>
    %100 = math.exp %99 : vector<8x128xf32>
    %cst_32 = arith.constant 1.000000e+00 : f32
    %101 = vector.broadcast %cst_32 : f32 to vector<8x128xf32>
    %102 = arith.addf %101, %100 : vector<8x128xf32>
    %103 = arith.divf %101, %102 : vector<8x128xf32>
    %104 = vector.extract_strided_slice %86 {offsets = [0, 256], sizes = [8, 128], strides = [1, 1]} : vector<8x384xf32> to vector<8x128xf32>
    %105 = vector.extract_strided_slice %87 {offsets = [0, 256], sizes = [8, 128], strides = [1, 1]} : vector<8x384xf32> to vector<8x128xf32>
    %106 = vector.broadcast %11 : vector<1x128xf32> to vector<8x128xf32>
    %107 = arith.addf %105, %106 : vector<8x128xf32>
    %108 = arith.mulf %95, %107 : vector<8x128xf32>
    %109 = arith.addf %104, %108 : vector<8x128xf32>
    %110 = math.tanh %109 : vector<8x128xf32>
    %cst_33 = arith.constant 1.000000e+00 : f32
    %111 = vector.broadcast %cst_33 : f32 to vector<8x128xf32>
    %112 = arith.subf %111, %103 : vector<8x128xf32>
    %113 = arith.mulf %112, %110 : vector<8x128xf32>
    %114 = arith.mulf %103, %80 : vector<8x128xf32>
    %115 = arith.addf %113, %114 : vector<8x128xf32>
    %116 = arith.index_cast %84 : i32 to index
    %c0_34 = arith.constant 0 : index
    %117 = vector.load %arg11[%116, %c0_34] : memref<64x128xf32, #tpu.memory_space<vmem>>, vector<8x128xf32>
    tpu.vector_store %arg11[%116, %c0_34], %115 {strides = array<i32>} : memref<64x128xf32, #tpu.memory_space<vmem>>, vector<8x128xf32>,
    %c3_i32 = arith.constant 3 : i32
    %c8_i32_35 = arith.constant 8 : i32
    %118 = arith.muli %c3_i32, %c8_i32_35 : i32
    %119 = tpu.assume_multiple %118, 8 : i32
    %120 = arith.index_cast %119 : i32 to index
    %c0_36 = arith.constant 0 : index
    %121 = vector.load %arg10[%120, %c0_36] : memref<64x384xf32, #tpu.memory_space<vmem>>, vector<8x384xf32>
    %cst_37 = arith.constant dense<0.000000e+00> : vector<8x384xf32>
    %122 = tpu.matmul %115, %10, %cst_37 {dimension_numbers = #tpu.dot_dimension_numbers<[1], [0], [0], [1], [0, 0, 1, 1], [], []>} : vector<8x128xf32>, vector<128x384xf32>, vector<8x384xf32> -> vector<8x384xf32>
    %123 = vector.extract_strided_slice %121 {offsets = [0, 0], sizes = [8, 128], strides = [1, 1]} : vector<8x384xf32> to vector<8x128xf32>
    %124 = vector.extract_strided_slice %122 {offsets = [0, 0], sizes = [8, 128], strides = [1, 1]} : vector<8x384xf32> to vector<8x128xf32>
    %125 = arith.addf %123, %124 : vector<8x128xf32>
    %126 = arith.negf %125 : vector<8x128xf32>
    %127 = math.exp %126 : vector<8x128xf32>
    %cst_38 = arith.constant 1.000000e+00 : f32
    %128 = vector.broadcast %cst_38 : f32 to vector<8x128xf32>
    %129 = arith.addf %128, %127 : vector<8x128xf32>
    %130 = arith.divf %128, %129 : vector<8x128xf32>
    %131 = vector.extract_strided_slice %121 {offsets = [0, 128], sizes = [8, 128], strides = [1, 1]} : vector<8x384xf32> to vector<8x128xf32>
    %132 = vector.extract_strided_slice %122 {offsets = [0, 128], sizes = [8, 128], strides = [1, 1]} : vector<8x384xf32> to vector<8x128xf32>
    %133 = arith.addf %131, %132 : vector<8x128xf32>
    %134 = arith.negf %133 : vector<8x128xf32>
    %135 = math.exp %134 : vector<8x128xf32>
    %cst_39 = arith.constant 1.000000e+00 : f32
    %136 = vector.broadcast %cst_39 : f32 to vector<8x128xf32>
    %137 = arith.addf %136, %135 : vector<8x128xf32>
    %138 = arith.divf %136, %137 : vector<8x128xf32>
    %139 = vector.extract_strided_slice %121 {offsets = [0, 256], sizes = [8, 128], strides = [1, 1]} : vector<8x384xf32> to vector<8x128xf32>
    %140 = vector.extract_strided_slice %122 {offsets = [0, 256], sizes = [8, 128], strides = [1, 1]} : vector<8x384xf32> to vector<8x128xf32>
    %141 = vector.broadcast %11 : vector<1x128xf32> to vector<8x128xf32>
    %142 = arith.addf %140, %141 : vector<8x128xf32>
    %143 = arith.mulf %130, %142 : vector<8x128xf32>
    %144 = arith.addf %139, %143 : vector<8x128xf32>
    %145 = math.tanh %144 : vector<8x128xf32>
    %cst_40 = arith.constant 1.000000e+00 : f32
    %146 = vector.broadcast %cst_40 : f32 to vector<8x128xf32>
    %147 = arith.subf %146, %138 : vector<8x128xf32>
    %148 = arith.mulf %147, %145 : vector<8x128xf32>
    %149 = arith.mulf %138, %115 : vector<8x128xf32>
    %150 = arith.addf %148, %149 : vector<8x128xf32>
    %151 = arith.index_cast %119 : i32 to index
    %c0_41 = arith.constant 0 : index
    %152 = vector.load %arg11[%151, %c0_41] : memref<64x128xf32, #tpu.memory_space<vmem>>, vector<8x128xf32>
    tpu.vector_store %arg11[%151, %c0_41], %150 {strides = array<i32>} : memref<64x128xf32, #tpu.memory_space<vmem>>, vector<8x128xf32>,
    %c4_i32 = arith.constant 4 : i32
    %c8_i32_42 = arith.constant 8 : i32
    %153 = arith.muli %c4_i32, %c8_i32_42 : i32
    %154 = tpu.assume_multiple %153, 8 : i32
    %155 = arith.index_cast %154 : i32 to index
    %c0_43 = arith.constant 0 : index
    %156 = vector.load %arg10[%155, %c0_43] : memref<64x384xf32, #tpu.memory_space<vmem>>, vector<8x384xf32>
    %cst_44 = arith.constant dense<0.000000e+00> : vector<8x384xf32>
    %157 = tpu.matmul %150, %10, %cst_44 {dimension_numbers = #tpu.dot_dimension_numbers<[1], [0], [0], [1], [0, 0, 1, 1], [], []>} : vector<8x128xf32>, vector<128x384xf32>, vector<8x384xf32> -> vector<8x384xf32>
    %158 = vector.extract_strided_slice %156 {offsets = [0, 0], sizes = [8, 128], strides = [1, 1]} : vector<8x384xf32> to vector<8x128xf32>
    %159 = vector.extract_strided_slice %157 {offsets = [0, 0], sizes = [8, 128], strides = [1, 1]} : vector<8x384xf32> to vector<8x128xf32>
    %160 = arith.addf %158, %159 : vector<8x128xf32>
    %161 = arith.negf %160 : vector<8x128xf32>
    %162 = math.exp %161 : vector<8x128xf32>
    %cst_45 = arith.constant 1.000000e+00 : f32
    %163 = vector.broadcast %cst_45 : f32 to vector<8x128xf32>
    %164 = arith.addf %163, %162 : vector<8x128xf32>
    %165 = arith.divf %163, %164 : vector<8x128xf32>
    %166 = vector.extract_strided_slice %156 {offsets = [0, 128], sizes = [8, 128], strides = [1, 1]} : vector<8x384xf32> to vector<8x128xf32>
    %167 = vector.extract_strided_slice %157 {offsets = [0, 128], sizes = [8, 128], strides = [1, 1]} : vector<8x384xf32> to vector<8x128xf32>
    %168 = arith.addf %166, %167 : vector<8x128xf32>
    %169 = arith.negf %168 : vector<8x128xf32>
    %170 = math.exp %169 : vector<8x128xf32>
    %cst_46 = arith.constant 1.000000e+00 : f32
    %171 = vector.broadcast %cst_46 : f32 to vector<8x128xf32>
    %172 = arith.addf %171, %170 : vector<8x128xf32>
    %173 = arith.divf %171, %172 : vector<8x128xf32>
    %174 = vector.extract_strided_slice %156 {offsets = [0, 256], sizes = [8, 128], strides = [1, 1]} : vector<8x384xf32> to vector<8x128xf32>
    %175 = vector.extract_strided_slice %157 {offsets = [0, 256], sizes = [8, 128], strides = [1, 1]} : vector<8x384xf32> to vector<8x128xf32>
    %176 = vector.broadcast %11 : vector<1x128xf32> to vector<8x128xf32>
    %177 = arith.addf %175, %176 : vector<8x128xf32>
    %178 = arith.mulf %165, %177 : vector<8x128xf32>
    %179 = arith.addf %174, %178 : vector<8x128xf32>
    %180 = math.tanh %179 : vector<8x128xf32>
    %cst_47 = arith.constant 1.000000e+00 : f32
    %181 = vector.broadcast %cst_47 : f32 to vector<8x128xf32>
    %182 = arith.subf %181, %173 : vector<8x128xf32>
    %183 = arith.mulf %182, %180 : vector<8x128xf32>
    %184 = arith.mulf %173, %150 : vector<8x128xf32>
    %185 = arith.addf %183, %184 : vector<8x128xf32>
    %186 = arith.index_cast %154 : i32 to index
    %c0_48 = arith.constant 0 : index
    %187 = vector.load %arg11[%186, %c0_48] : memref<64x128xf32, #tpu.memory_space<vmem>>, vector<8x128xf32>
    tpu.vector_store %arg11[%186, %c0_48], %185 {strides = array<i32>} : memref<64x128xf32, #tpu.memory_space<vmem>>, vector<8x128xf32>,
    %c5_i32 = arith.constant 5 : i32
    %c8_i32_49 = arith.constant 8 : i32
    %188 = arith.muli %c5_i32, %c8_i32_49 : i32
    %189 = tpu.assume_multiple %188, 8 : i32
    %190 = arith.index_cast %189 : i32 to index
    %c0_50 = arith.constant 0 : index
    %191 = vector.load %arg10[%190, %c0_50] : memref<64x384xf32, #tpu.memory_space<vmem>>, vector<8x384xf32>
    %cst_51 = arith.constant dense<0.000000e+00> : vector<8x384xf32>
    %192 = tpu.matmul %185, %10, %cst_51 {dimension_numbers = #tpu.dot_dimension_numbers<[1], [0], [0], [1], [0, 0, 1, 1], [], []>} : vector<8x128xf32>, vector<128x384xf32>, vector<8x384xf32> -> vector<8x384xf32>
    %193 = vector.extract_strided_slice %191 {offsets = [0, 0], sizes = [8, 128], strides = [1, 1]} : vector<8x384xf32> to vector<8x128xf32>
    %194 = vector.extract_strided_slice %192 {offsets = [0, 0], sizes = [8, 128], strides = [1, 1]} : vector<8x384xf32> to vector<8x128xf32>
    %195 = arith.addf %193, %194 : vector<8x128xf32>
    %196 = arith.negf %195 : vector<8x128xf32>
    %197 = math.exp %196 : vector<8x128xf32>
    %cst_52 = arith.constant 1.000000e+00 : f32
    %198 = vector.broadcast %cst_52 : f32 to vector<8x128xf32>
    %199 = arith.addf %198, %197 : vector<8x128xf32>
    %200 = arith.divf %198, %199 : vector<8x128xf32>
    %201 = vector.extract_strided_slice %191 {offsets = [0, 128], sizes = [8, 128], strides = [1, 1]} : vector<8x384xf32> to vector<8x128xf32>
    %202 = vector.extract_strided_slice %192 {offsets = [0, 128], sizes = [8, 128], strides = [1, 1]} : vector<8x384xf32> to vector<8x128xf32>
    %203 = arith.addf %201, %202 : vector<8x128xf32>
    %204 = arith.negf %203 : vector<8x128xf32>
    %205 = math.exp %204 : vector<8x128xf32>
    %cst_53 = arith.constant 1.000000e+00 : f32
    %206 = vector.broadcast %cst_53 : f32 to vector<8x128xf32>
    %207 = arith.addf %206, %205 : vector<8x128xf32>
    %208 = arith.divf %206, %207 : vector<8x128xf32>
    %209 = vector.extract_strided_slice %191 {offsets = [0, 256], sizes = [8, 128], strides = [1, 1]} : vector<8x384xf32> to vector<8x128xf32>
    %210 = vector.extract_strided_slice %192 {offsets = [0, 256], sizes = [8, 128], strides = [1, 1]} : vector<8x384xf32> to vector<8x128xf32>
    %211 = vector.broadcast %11 : vector<1x128xf32> to vector<8x128xf32>
    %212 = arith.addf %210, %211 : vector<8x128xf32>
    %213 = arith.mulf %200, %212 : vector<8x128xf32>
    %214 = arith.addf %209, %213 : vector<8x128xf32>
    %215 = math.tanh %214 : vector<8x128xf32>
    %cst_54 = arith.constant 1.000000e+00 : f32
    %216 = vector.broadcast %cst_54 : f32 to vector<8x128xf32>
    %217 = arith.subf %216, %208 : vector<8x128xf32>
    %218 = arith.mulf %217, %215 : vector<8x128xf32>
    %219 = arith.mulf %208, %185 : vector<8x128xf32>
    %220 = arith.addf %218, %219 : vector<8x128xf32>
    %221 = arith.index_cast %189 : i32 to index
    %c0_55 = arith.constant 0 : index
    %222 = vector.load %arg11[%221, %c0_55] : memref<64x128xf32, #tpu.memory_space<vmem>>, vector<8x128xf32>
    tpu.vector_store %arg11[%221, %c0_55], %220 {strides = array<i32>} : memref<64x128xf32, #tpu.memory_space<vmem>>, vector<8x128xf32>,
    %c6_i32 = arith.constant 6 : i32
    %c8_i32_56 = arith.constant 8 : i32
    %223 = arith.muli %c6_i32, %c8_i32_56 : i32
    %224 = tpu.assume_multiple %223, 8 : i32
    %225 = arith.index_cast %224 : i32 to index
    %c0_57 = arith.constant 0 : index
    %226 = vector.load %arg10[%225, %c0_57] : memref<64x384xf32, #tpu.memory_space<vmem>>, vector<8x384xf32>
    %cst_58 = arith.constant dense<0.000000e+00> : vector<8x384xf32>
    %227 = tpu.matmul %220, %10, %cst_58 {dimension_numbers = #tpu.dot_dimension_numbers<[1], [0], [0], [1], [0, 0, 1, 1], [], []>} : vector<8x128xf32>, vector<128x384xf32>, vector<8x384xf32> -> vector<8x384xf32>
    %228 = vector.extract_strided_slice %226 {offsets = [0, 0], sizes = [8, 128], strides = [1, 1]} : vector<8x384xf32> to vector<8x128xf32>
    %229 = vector.extract_strided_slice %227 {offsets = [0, 0], sizes = [8, 128], strides = [1, 1]} : vector<8x384xf32> to vector<8x128xf32>
    %230 = arith.addf %228, %229 : vector<8x128xf32>
    %231 = arith.negf %230 : vector<8x128xf32>
    %232 = math.exp %231 : vector<8x128xf32>
    %cst_59 = arith.constant 1.000000e+00 : f32
    %233 = vector.broadcast %cst_59 : f32 to vector<8x128xf32>
    %234 = arith.addf %233, %232 : vector<8x128xf32>
    %235 = arith.divf %233, %234 : vector<8x128xf32>
    %236 = vector.extract_strided_slice %226 {offsets = [0, 128], sizes = [8, 128], strides = [1, 1]} : vector<8x384xf32> to vector<8x128xf32>
    %237 = vector.extract_strided_slice %227 {offsets = [0, 128], sizes = [8, 128], strides = [1, 1]} : vector<8x384xf32> to vector<8x128xf32>
    %238 = arith.addf %236, %237 : vector<8x128xf32>
    %239 = arith.negf %238 : vector<8x128xf32>
    %240 = math.exp %239 : vector<8x128xf32>
    %cst_60 = arith.constant 1.000000e+00 : f32
    %241 = vector.broadcast %cst_60 : f32 to vector<8x128xf32>
    %242 = arith.addf %241, %240 : vector<8x128xf32>
    %243 = arith.divf %241, %242 : vector<8x128xf32>
    %244 = vector.extract_strided_slice %226 {offsets = [0, 256], sizes = [8, 128], strides = [1, 1]} : vector<8x384xf32> to vector<8x128xf32>
    %245 = vector.extract_strided_slice %227 {offsets = [0, 256], sizes = [8, 128], strides = [1, 1]} : vector<8x384xf32> to vector<8x128xf32>
    %246 = vector.broadcast %11 : vector<1x128xf32> to vector<8x128xf32>
    %247 = arith.addf %245, %246 : vector<8x128xf32>
    %248 = arith.mulf %235, %247 : vector<8x128xf32>
    %249 = arith.addf %244, %248 : vector<8x128xf32>
    %250 = math.tanh %249 : vector<8x128xf32>
    %cst_61 = arith.constant 1.000000e+00 : f32
    %251 = vector.broadcast %cst_61 : f32 to vector<8x128xf32>
    %252 = arith.subf %251, %243 : vector<8x128xf32>
    %253 = arith.mulf %252, %250 : vector<8x128xf32>
    %254 = arith.mulf %243, %220 : vector<8x128xf32>
    %255 = arith.addf %253, %254 : vector<8x128xf32>
    %256 = arith.index_cast %224 : i32 to index
    %c0_62 = arith.constant 0 : index
    %257 = vector.load %arg11[%256, %c0_62] : memref<64x128xf32, #tpu.memory_space<vmem>>, vector<8x128xf32>
    tpu.vector_store %arg11[%256, %c0_62], %255 {strides = array<i32>} : memref<64x128xf32, #tpu.memory_space<vmem>>, vector<8x128xf32>,
    %c7_i32 = arith.constant 7 : i32
    %c8_i32_63 = arith.constant 8 : i32
    %258 = arith.muli %c7_i32, %c8_i32_63 : i32
    %259 = tpu.assume_multiple %258, 8 : i32
    %260 = arith.index_cast %259 : i32 to index
    %c0_64 = arith.constant 0 : index
    %261 = vector.load %arg10[%260, %c0_64] : memref<64x384xf32, #tpu.memory_space<vmem>>, vector<8x384xf32>
    %cst_65 = arith.constant dense<0.000000e+00> : vector<8x384xf32>
    %262 = tpu.matmul %255, %10, %cst_65 {dimension_numbers = #tpu.dot_dimension_numbers<[1], [0], [0], [1], [0, 0, 1, 1], [], []>} : vector<8x128xf32>, vector<128x384xf32>, vector<8x384xf32> -> vector<8x384xf32>
    %263 = vector.extract_strided_slice %261 {offsets = [0, 0], sizes = [8, 128], strides = [1, 1]} : vector<8x384xf32> to vector<8x128xf32>
    %264 = vector.extract_strided_slice %262 {offsets = [0, 0], sizes = [8, 128], strides = [1, 1]} : vector<8x384xf32> to vector<8x128xf32>
    %265 = arith.addf %263, %264 : vector<8x128xf32>
    %266 = arith.negf %265 : vector<8x128xf32>
    %267 = math.exp %266 : vector<8x128xf32>
    %cst_66 = arith.constant 1.000000e+00 : f32
    %268 = vector.broadcast %cst_66 : f32 to vector<8x128xf32>
    %269 = arith.addf %268, %267 : vector<8x128xf32>
    %270 = arith.divf %268, %269 : vector<8x128xf32>
    %271 = vector.extract_strided_slice %261 {offsets = [0, 128], sizes = [8, 128], strides = [1, 1]} : vector<8x384xf32> to vector<8x128xf32>
    %272 = vector.extract_strided_slice %262 {offsets = [0, 128], sizes = [8, 128], strides = [1, 1]} : vector<8x384xf32> to vector<8x128xf32>
    %273 = arith.addf %271, %272 : vector<8x128xf32>
    %274 = arith.negf %273 : vector<8x128xf32>
    %275 = math.exp %274 : vector<8x128xf32>
    %cst_67 = arith.constant 1.000000e+00 : f32
    %276 = vector.broadcast %cst_67 : f32 to vector<8x128xf32>
    %277 = arith.addf %276, %275 : vector<8x128xf32>
    %278 = arith.divf %276, %277 : vector<8x128xf32>
    %279 = vector.extract_strided_slice %261 {offsets = [0, 256], sizes = [8, 128], strides = [1, 1]} : vector<8x384xf32> to vector<8x128xf32>
    %280 = vector.extract_strided_slice %262 {offsets = [0, 256], sizes = [8, 128], strides = [1, 1]} : vector<8x384xf32> to vector<8x128xf32>
    %281 = vector.broadcast %11 : vector<1x128xf32> to vector<8x128xf32>
    %282 = arith.addf %280, %281 : vector<8x128xf32>
    %283 = arith.mulf %270, %282 : vector<8x128xf32>
    %284 = arith.addf %279, %283 : vector<8x128xf32>
    %285 = math.tanh %284 : vector<8x128xf32>
    %cst_68 = arith.constant 1.000000e+00 : f32
    %286 = vector.broadcast %cst_68 : f32 to vector<8x128xf32>
    %287 = arith.subf %286, %278 : vector<8x128xf32>
    %288 = arith.mulf %287, %285 : vector<8x128xf32>
    %289 = arith.mulf %278, %255 : vector<8x128xf32>
    %290 = arith.addf %288, %289 : vector<8x128xf32>
    %291 = arith.index_cast %259 : i32 to index
    %c0_69 = arith.constant 0 : index
    %292 = vector.load %arg11[%291, %c0_69] : memref<64x128xf32, #tpu.memory_space<vmem>>, vector<8x128xf32>
    tpu.vector_store %arg11[%291, %c0_69], %290 {strides = array<i32>} : memref<64x128xf32, #tpu.memory_space<vmem>>, vector<8x128xf32>,
    %c8_i32_70 = arith.constant 8 : i32
    %c0_71 = arith.constant 0 : index
    %c0_72 = arith.constant 0 : index
    %293 = vector.load %arg12[%c0_71, %c0_72] : memref<8x128xf32, #tpu.memory_space<vmem>>, vector<8x128xf32>
    tpu.vector_store %arg12[%c0_71, %c0_72], %290 {strides = array<i32>} : memref<8x128xf32, #tpu.memory_space<vmem>>, vector<8x128xf32>,
    %c0_73 = arith.constant 0 : index
    %c0_74 = arith.constant 0 : index
    %294 = vector.load %arg9[%c0_73, %c0_74] : memref<8x128xf32, #tpu.memory_space<vmem>>, vector<8x128xf32>
    tpu.vector_store %arg9[%c0_73, %c0_74], %290 {strides = array<i32>} : memref<8x128xf32, #tpu.memory_space<vmem>>, vector<8x128xf32>,
    %c0_75 = arith.constant 0 : index
    %c0_76 = arith.constant 0 : index
    %295 = vector.load %arg11[%c0_75, %c0_76] : memref<64x128xf32, #tpu.memory_space<vmem>>, vector<64x128xf32>
    %c0_77 = arith.constant 0 : index
    %c0_78 = arith.constant 0 : index
    %296 = vector.load %arg6[%c0_77, %c0_78] : memref<128x128xf32, #tpu.memory_space<vmem>>, vector<128x128xf32>
    %cst_79 = arith.constant dense<0.000000e+00> : vector<64x128xf32>
    %297 = tpu.matmul %295, %296, %cst_79 {dimension_numbers = #tpu.dot_dimension_numbers<[1], [0], [0], [1], [0, 0, 1, 1], [], []>} : vector<64x128xf32>, vector<128x128xf32>, vector<64x128xf32> -> vector<64x128xf32>
    %c0_80 = arith.constant 0 : index
    %c0_81 = arith.constant 0 : index
    %298 = vector.load %arg7[%c0_80, %c0_81] : memref<1x128xf32, #tpu.memory_space<vmem>>, vector<1x128xf32>
    %299 = vector.broadcast %298 : vector<1x128xf32> to vector<64x128xf32>
    %300 = arith.addf %297, %299 : vector<64x128xf32>
    %c0_82 = arith.constant 0 : index
    %c0_83 = arith.constant 0 : index
    %301 = vector.load %arg8[%c0_82, %c0_83] : memref<64x128xf32, #tpu.memory_space<vmem>>, vector<64x128xf32>
    tpu.vector_store %arg8[%c0_82, %c0_83], %300 {strides = array<i32>} : memref<64x128xf32, #tpu.memory_space<vmem>>, vector<64x128xf32>,
    return
  }
  func.func @transform_0(%arg0: i32) -> (i32, i32) {
    %c0_i32 = arith.constant 0 : i32
    %c0_i32_0 = arith.constant 0 : i32
    return %arg0, %c0_i32 : i32, i32
  }
  func.func @transform_1(%arg0: i32) -> (i32, i32) {
    %c0_i32 = arith.constant 0 : i32
    %c0_i32_0 = arith.constant 0 : i32
    %c0_i32_1 = arith.constant 0 : i32
    return %c0_i32, %c0_i32_0 : i32, i32
  }
  func.func @transform_2(%arg0: i32) -> (i32, i32) {
    %c0_i32 = arith.constant 0 : i32
    %c0_i32_0 = arith.constant 0 : i32
    %c0_i32_1 = arith.constant 0 : i32
    return %c0_i32, %c0_i32_0 : i32, i32
  }
  func.func @transform_3(%arg0: i32) -> (i32, i32) {
    %c0_i32 = arith.constant 0 : i32
    %c0_i32_0 = arith.constant 0 : i32
    %c0_i32_1 = arith.constant 0 : i32
    return %c0_i32, %c0_i32_0 : i32, i32
  }
  func.func @transform_4(%arg0: i32) -> (i32, i32) {
    %c0_i32 = arith.constant 0 : i32
    %c0_i32_0 = arith.constant 0 : i32
    %c0_i32_1 = arith.constant 0 : i32
    return %c0_i32, %c0_i32_0 : i32, i32
  }
  func.func @transform_5(%arg0: i32) -> (i32, i32) {
    %c0_i32 = arith.constant 0 : i32
    %c0_i32_0 = arith.constant 0 : i32
    %c0_i32_1 = arith.constant 0 : i32
    return %c0_i32, %c0_i32_0 : i32, i32
  }
  func.func @transform_6(%arg0: i32) -> (i32, i32) {
    %c0_i32 = arith.constant 0 : i32
    %c0_i32_0 = arith.constant 0 : i32
    %c0_i32_1 = arith.constant 0 : i32
    return %c0_i32, %c0_i32_0 : i32, i32
  }
  func.func @transform_7(%arg0: i32) -> (i32, i32) {
    %c0_i32 = arith.constant 0 : i32
    %c0_i32_0 = arith.constant 0 : i32
    return %arg0, %c0_i32 : i32, i32
  }
  func.func @transform_8(%arg0: i32) -> (i32, i32) {
    %c0_i32 = arith.constant 0 : i32
    %c0_i32_0 = arith.constant 0 : i32
    %c0_i32_1 = arith.constant 0 : i32
    return %c0_i32, %c0_i32_0 : i32, i32
  }
}

</mosaic_0001>

<bundles_post_ra>
// kernel: gru_model_forward.1
= control target key start
LH: loop header
LB: loop body
LE: loop exit
PB: predicated region body
PF: predicated region fallthrough
CT: control target
= control target key end

     0   :  { %vm84_vm0 = vcmask 1043456   ;;  %vm59_vm1 = vcmask 31744   ;;  %v1488_v57 = vmov 0.0   ;;  %s2716_s1 = inlined_call_operand.vmem [shape: f32[4,384], index: 1, kind: input, shape index: {}]   ;;  %s2717_s0 = inlined_call_operand.vmem [shape: f32[64,4], index: 0, kind: input, shape index: {}]   ;;  %s2718_s2 = inlined_call_operand.vmem [shape: f32[128,384], index: 2, kind: input, shape index: {}]   ;;  %s2719_s4 = inlined_call_operand.vmem [shape: f32[1,128], index: 4, kind: input, shape index: {}]   ;;  %s2720_s3 = inlined_call_operand.vmem [shape: f32[1,384], index: 3, kind: input, shape index: {}]   ;;  %s2721_s5 = inlined_call_operand.vmem [shape: f32[128,128], index: 5, kind: input, shape index: {}]   ;;  %s2722_s6 = inlined_call_operand.vmem [shape: f32[1,128], index: 6, kind: input, shape index: {}]   ;;  %s2723_s7 = inlined_call_operand.vmem [shape: f32[64,128], index: 7, kind: output, shape index: {0}]   ;;  %s2724_s8 = inlined_call_operand.vmem [shape: f32[8,128], index: 8, kind: output, shape index: {1}]  }
   0x1   :  { %v42_v0 = vld [vmem:[%s2716_s1 + $0x8] sm:$0xf]  ;;  %v41_v1 = vld [vmem:[%s2716_s1] sm:$0xff]  ;;  %v1559_v7 = vld [vmem:[%s2718_s2 + $0x178] sm:$0xff] }
   0x2   :  { %55 = vst [vmem:[#allocation1 + $0x10] ss:$2 sm:$0xff] %v42_v0  ;;  %v1543_v2 = vld [vmem:[%s2717_s0 + $0x20] sm:$0xff]  ;;  %v1548_v4 = vld [vmem:[%s2718_s2 + $0x168] sm:$0xff]  ;;  %v1568_v8 = vld [vmem:[%s2718_s2 + $0x150] sm:$0xff] }
   0x3   :  { %53 = vst [vmem:[#allocation1] ss:$2 sm:$0xff] %v41_v1  ;;  %v1553_v5 = vld [vmem:[%s2717_s0] sm:$0xff]  ;;  %v1581_v10 = vld [vmem:[%s2718_s2 + $0x138] sm:$0xff]  ;;  %v1587_v11 = vld [vmem:[%s2718_s2 + $0x170] sm:$0xff] }
   0x4   :  { %v1576_v9 = vld [vmem:[%s2718_s2 + $0x160] sm:$0xff]  ;;  %v1595_v12 = vld [vmem:[%s2718_s2 + $0x148] sm:$0xff]  ;;  %v1607_v14 = vld [vmem:[%s2718_s2 + $0x158] sm:$0xff] }
   0x5   :  { %v1601_v13 = vld [vmem:[%s2718_s2 + $0x120] sm:$0xff]  ;;  %v1613_v15 = vld [vmem:[%s2717_s0 + $0x28] sm:$0xff]  ;;  %v1618_v16 = vld [vmem:[%s2718_s2 + $0x130] sm:$0xff] }
   0x6   :  { %v1624_v17 = vld [vmem:[%s2718_s2 + $0x108] sm:$0xff]  ;;  %v1635_v19 = vld [vmem:[%s2718_s2 + $0x140] sm:$0xff]  ;;  %v1644_v20 = vld [vmem:[%s2718_s2 + $0xf0] sm:$0xff] }
   0x7   :  { %v1629_v18 = vld [vmem:[%s2717_s0 + $0x8] sm:$0xff]  ;;  %v1650_v21 = vld [vmem:[%s2718_s2 + $0x118] sm:$0xff]  ;;  %v1671_v24 = vld [vmem:[%s2718_s2 + $0x110] sm:$0xff] }
   0x8   :  { %v1658_v22 = vld [vmem:[%s2718_s2 + $0x128] sm:$0xff]  ;;  %v1663_v23 = vld [vmem:[%s2718_s2 + $0xd8] sm:$0xff]  ;;  %v1678_v25 = vld [vmem:[%s2718_s2 + $0xc0] sm:$0xff] }
   0x9   :  { %v58_v3 = vld.sshfl [vmem:[#allocation1 + $0x10] sm:$0xff pattern:$0x75316420]  ;;  %v1683_v26 = vld [vmem:[%s2718_s2 + $0x100] sm:$0xff]  ;;  %v1695_v28 = vld [vmem:[%s2718_s2 + $0xf8] sm:$0xff] }
   0xa   :  { %1355 = vmatpush.msk.msra.mxu3 %vm84_vm0, %v58_v3  ;;  %v56_v6 = vld.sshfl [vmem:[#allocation1] sm:$0xff pattern:$0x75316420]  ;;  %1330 = vmatpush.msk.msra.mxu2 %vm84_vm0, %v58_v3  ;;  %v1690_v27 = vld [vmem:[%s2717_s0 + $0x30] sm:$0xff]  ;;  %v1701_v29 = vld [vmem:[%s2718_s2 + $0xa8] sm:$0xff] }
   0xb   :  { %1335 = vmatmul.msk.f32.vlgmr.msra.gmra.mxu3 %vm59_vm1, %v1543_v2  ;;  %1312 = vmatpush.msk.msra.mxu0 %vm84_vm0, %v56_v6  ;;  %v1706_v30 = vld [vmem:[%s2717_s0 + $0x10] sm:$0xff]  ;;  %v1713_v31 = vld [vmem:[%s2718_s2 + $0xe8] sm:$0xff]  ;;  %v1729_v33 = vld [vmem:[%s2718_s2 + $0xe0] sm:$0xff] }
   0xc   :  { %294 = vmatpush.msrb.mxu3 %v1548_v4  ;;  %1313 = vmatmul.msk.f32.vlgmr.msra.gmra.mxu0 %vm59_vm1, %v1553_v5  ;;  %v1720_v32 = vld [vmem:[%s2718_s2 + $0x90] sm:$0xff]  ;;  %v1739_v35 = vld [vmem:[%s2718_s2 + $0x78] sm:$0xff]  ;;  %v1747_v36 = vld [vmem:[%s2718_s2 + $0xc8] sm:$0xff] }
   0xd   :  { %334 = vmatpush.msrb.mxu0 %v1559_v7  ;;  %1331 = vmatmul.msk.f32.vlgmr.msra.gmra.mxu2 %vm59_vm1, %v1553_v5  ;;  %v1734_v34 = vld [vmem:[%s2718_s2 + $0xd0] sm:$0xff]  ;;  %v1752_v37 = vld [vmem:[%s2718_s2 + $0xb8] sm:$0xff]  ;;  %v1759_v38 = vld [vmem:[%s2718_s2 + $0x60] sm:$0xff] }
   0xe   :  { %295 = vmatpush.msrb.mxu3 %v1568_v8  ;;  %432 = vmatpush.msrb.mxu2 %v1587_v11  ;;  %v1767_v39 = vld [vmem:[%s2717_s0 + $0x38] sm:$0xff]  ;;  %v1772_v40 = vld [vmem:[%s2718_s2 + $0xb0] sm:$0xff]  ;;  %v1777_v41 = vld [vmem:[%s2718_s2 + $0xa0] sm:$0xff] }
   0xf   :  { %335 = vmatpush.msrb.mxu0 %v1576_v9  ;;  %v1782_v42 = vld [vmem:[%s2718_s2 + $0x48] sm:$0xff]  ;;  %v1787_v43 = vld [vmem:[%s2717_s0 + $0x18] sm:$0xff]  ;;  %v1802_v45 = vld [vmem:[%s2718_s2 + $0x30] sm:$0xff] }
  0x10   :  { %296 = vmatpush.msrb.mxu3 %v1581_v10  ;;  %433 = vmatpush.msrb.mxu2 %v1607_v14  ;;  %v1795_v44 = vld [vmem:[%s2718_s2 + $0x88] sm:$0xff]  ;;  %2748 = vst [vmem:[#allocation5_spill] sm:$0xff] %v1802_v45  ;;  %v1811_v46 = vld [vmem:[%s2718_s2 + $0x98] sm:$0xff]  ;;  %v1816_v47 = vld [vmem:[%s2718_s2 + $0x70] sm:$0xff] }
  0x11   :  { %336 = vmatpush.msrb.mxu0 %v1595_v12  ;;  %v1821_v48 = vld [vmem:[%s2718_s2 + $0x18] sm:$0xff]  ;;  %v1829_v49 = vld [vmem:[%s2718_s2 + $0x80] sm:$0xff]  ;;  %v1849_v52 = vld [vmem:[%s2718_s2 + $0x68] sm:$0xff] }
  0x12   :  { %297 = vmatpush.msrb.mxu3 %v1601_v13  ;;  %434 = vmatpush.msrb.mxu2 %v1635_v19  ;;  %2749 = vst [vmem:[#allocation6_spill] sm:$0xff] %v1821_v48  ;;  %v1834_v50 = vld [vmem:[%s2718_s2 + $0x58] sm:$0xff]  ;;  %v1841_v51 = vld [vmem:[%s2718_s2] sm:$0xff]  ;;  %v1862_v54 = vld [vmem:[%s2718_s2 + $0x28] sm:$0xff] }
  0x13   :  { %1336 = vmatmul.msk.f32.gmra.mxu3 %vm59_vm1, %v1613_v15  ;;  %337 = vmatpush.msrb.mxu0 %v1618_v16  ;;  %2750 = vst [vmem:[#allocation7_spill] sm:$0xff] %v1841_v51  ;;  %v1854_v53 = vld [vmem:[%s2718_s2 + $0x40] sm:$0xff]  ;;  %v57_v55 = vld.sshfl [vmem:[#allocation1 + $0x8] sm:$0xff pattern:$0x75316420]  ;;  %v1869_v56 = vld [vmem:[%s2718_s2 + $0x10] sm:$0xff] }
  0x14   :  { %298 = vmatpush.msrb.mxu3 %v1624_v17  ;;  %1314 = vmatmul.msk.f32.gmra.mxu0 %vm59_vm1, %v1629_v18  ;;  %2751 = vst [vmem:[#allocation8_spill] sm:$0xff] %v1854_v53  ;;  %v1883_v58 = vld [vmem:[%s2718_s2 + $0x50] sm:$0xff]  ;;  %v1892_v59 = vld [vmem:[%s2718_s2 + $0x38] sm:$0xff]  ;;  %v1901_v60 = vld [vmem:[%s2718_s2 + $0x20] sm:$0xff] }
  0x15   :  { %338 = vmatpush.msrb.mxu0 %v1650_v21  ;;  %435 = vmatpush.msrb.mxu2 %v1658_v22  ;;  %2752 = vst [vmem:[#allocation9_spill] sm:$0xff] %v1862_v54  ;;  %v1911_v61 = vld [vmem:[%s2718_s2 + $0x8] sm:$0xff]  ;;  %v43_v63 = vld [vmem:[%s2720_s3] sm:$0x7] }
  0x16   :  { %299 = vmatpush.msrb.mxu3 %v1644_v20  ;;  %1332 = vmatmul.msk.f32.gmra.mxu2 %vm59_vm1, %v1629_v18  ;;  %2753 = vst [vmem:[#allocation10_spill] sm:$0xff] %v1869_v56  ;;  %v45_v1 = vperm.slane %v43_v63, 0 }
  0x17   :  { %436 = vmatpush.msrb.mxu2 %v1671_v24  ;;  %339 = vmatpush.msrb.mxu0 %v1683_v26  ;;  %2754 = vst [vmem:[#allocation11_spill] sm:$0xff] %v1883_v58 }
  0x18   :  { %300 = vmatpush.msrb.mxu3 %v1663_v23  ;;  %1321 = vmatpush.msk.msra.mxu1 %vm84_vm0, %v57_v55  ;;  %2755 = vst [vmem:[#allocation12_spill] sm:$0xff] %v1892_v59 }
  0x19   :  { %437 = vmatpush.msrb.mxu2 %v1695_v28  ;;  %340 = vmatpush.msrb.mxu0 %v1713_v31  ;;  %2756 = vst [vmem:[#allocation13_spill] sm:$0xff] %v1901_v60 }
  0x1a   :  { %301 = vmatpush.msrb.mxu3 %v1678_v25  ;;  %1322 = vmatmul.msk.f32.vlgmr.msra.gmra.mxu1 %vm59_vm1, %v1553_v5  ;;  %2757 = vst [vmem:[#allocation14_spill] sm:$0xff] %v1911_v61 }
  0x1b   :  { %1337 = vmatmul.msk.f32.gmra.mxu3 %vm59_vm1, %v1690_v27  ;;  %341 = vmatpush.msrb.mxu0 %v1734_v34 }
  0x1c   :  { %302 = vmatpush.msrb.mxu3 %v1701_v29  ;;  %1315 = vmatmul.msk.f32.gmra.mxu0 %vm59_vm1, %v1706_v30 }
  0x1d   :  { %438 = vmatpush.msrb.mxu2 %v1729_v33  ;;  %342 = vmatpush.msrb.mxu0 %v1752_v37 }
  0x1e   :  { %303 = vmatpush.msrb.mxu3 %v1720_v32  ;;  %1333 = vmatmul.msk.f32.gmra.mxu2 %vm59_vm1, %v1706_v30 }
  0x1f   :  { %439 = vmatpush.msrb.mxu2 %v1747_v36  ;;  %343 = vmatpush.msrb.mxu0 %v1777_v41 }
  0x20   :  { %304 = vmatpush.msrb.mxu3 %v1739_v35  ;;  %412 = vmatpush.msrb.mxu1 %v1548_v4 }
  0x21   :  { %440 = vmatpush.msrb.mxu2 %v1772_v40  ;;  %344 = vmatpush.msrb.mxu0 %v1795_v44 }
  0x22   :  { %305 = vmatpush.msrb.mxu3 %v1759_v38  ;;  %413 = vmatpush.msrb.mxu1 %v1568_v8 }
  0x23   :  { %1338 = vmatmul.msk.f32.gmra.mxu3 %vm59_vm1, %v1767_v39  ;;  %345 = vmatpush.msrb.mxu0 %v1816_v47 }
  0x24   :  { %306 = vmatpush.msrb.mxu3 %v1782_v42  ;;  %1316 = vmatmul.msk.f32.gmra.mxu0 %vm59_vm1, %v1787_v43 }
  0x25   :  { %441 = vmatpush.msrb.mxu2 %v1811_v46  ;;  %346 = vmatpush.msrb.mxu0 %v1834_v50 }
  0x26   :  { %307 = vmatpush.msrb.mxu3 %v1802_v45  ;;  %1334 = vmatmul.msk.f32.gmra.mxu2 %vm59_vm1, %v1787_v43 }
  0x27   :  { %442 = vmatpush.msrb.mxu2 %v1829_v49  ;;  %347 = vmatpush.msrb.mxu0 %v1854_v53 }
  0x28   :  { %308 = vmatpush.msrb.mxu3 %v1821_v48  ;;  %414 = vmatpush.msrb.mxu1 %v1581_v10 }
  0x29   :  { %443 = vmatpush.msrb.mxu2 %v1849_v52  ;;  %348 = vmatpush.msrb.mxu0 %v1862_v54 }
  0x2a   :  { %309 = vmatpush.msrb.mxu3 %v1841_v51  ;;  %415 = vmatpush.msrb.mxu1 %v1601_v13 }
  0x2b   :  { %310 = vmatmul.f32.vlgmr.msrb.gmra.mxu3 %v1488_v57  ;;  %349 = vmatpush.msrb.mxu0 %v1869_v56 }
  0x2c   :  { %314 = vmatpush.msra.mxu3 %v1587_v11  ;;  %1317 = vmatmul.msk.f32.gmra.mxu0 %vm59_vm1, %v1543_v2 }
  0x2d   :  { %444 = vmatpush.msrb.mxu2 %v1883_v58  ;;  %528 = vmatpush.msra.mxu0 %v1548_v4 }
  0x2e   :  { %315 = vmatpush.msra.mxu3 %v1607_v14  ;;  %1323 = vmatmul.msk.f32.gmra.mxu1 %vm59_vm1, %v1629_v18 }
  0x2f   :  { %445 = vmatpush.msrb.mxu2 %v1892_v59  ;;  %529 = vmatpush.msra.mxu0 %v1568_v8 }
  0x30   :  { %316 = vmatpush.msra.mxu3 %v1635_v19  ;;  %416 = vmatpush.msrb.mxu1 %v1624_v17 }
  0x31   :  { %446 = vmatpush.msrb.mxu2 %v1901_v60  ;;  %530 = vmatpush.msra.mxu0 %v1581_v10 }
  0x32   :  { %317 = vmatpush.msra.mxu3 %v1658_v22  ;;  %417 = vmatpush.msrb.mxu1 %v1644_v20 }
  0x33   :  { %447 = vmatpush.msrb.mxu2 %v1911_v61  ;;  %531 = vmatpush.msra.mxu0 %v1601_v13 }
  0x34   :  { %318 = vmatpush.msra.mxu3 %v1671_v24  ;;  %1318 = vmatmul.msk.f32.gmra.mxu0 %vm59_vm1, %v1613_v15 }
  0x35   :  { %568 = vmatpush.msra.mxu2 %v1559_v7  ;;  %418 = vmatpush.msrb.mxu1 %v1663_v23 }
  0x36   :  { %319 = vmatpush.msra.mxu3 %v1695_v28  ;;  %1324 = vmatmul.msk.f32.gmra.mxu1 %vm59_vm1, %v1706_v30 }
  0x37   :  { %569 = vmatpush.msra.mxu2 %v1576_v9  ;;  %419 = vmatpush.msrb.mxu1 %v1678_v25 }
  0x38   :  { %320 = vmatpush.msra.mxu3 %v1729_v33  ;;  %532 = vmatpush.msra.mxu0 %v1624_v17 }
  0x39   :  { %570 = vmatpush.msra.mxu2 %v1595_v12  ;;  %420 = vmatpush.msrb.mxu1 %v1701_v29 }
  0x3a   :  { %321 = vmatpush.msra.mxu3 %v1747_v36  ;;  %533 = vmatpush.msra.mxu0 %v1644_v20 }
  0x3b   :  { %571 = vmatpush.msra.mxu2 %v1618_v16  ;;  %421 = vmatpush.msrb.mxu1 %v1720_v32 }
  0x3c   :  { %322 = vmatpush.msra.mxu3 %v1772_v40  ;;  %1319 = vmatmul.msk.f32.gmra.mxu0 %vm59_vm1, %v1690_v27 }
  0x3d   :  { %572 = vmatpush.msra.mxu2 %v1650_v21  ;;  %422 = vmatpush.msrb.mxu1 %v1739_v35 }
  0x3e   :  { %323 = vmatpush.msra.mxu3 %v1811_v46  ;;  %1325 = vmatmul.msk.f32.gmra.mxu1 %vm59_vm1, %v1787_v43 }
  0x3f   :  { %573 = vmatpush.msra.mxu2 %v1683_v26  ;;  %423 = vmatpush.msrb.mxu1 %v1759_v38 }
  0x40   :  { %324 = vmatpush.msra.mxu3 %v1829_v49  ;;  %534 = vmatpush.msra.mxu0 %v1663_v23 }
  0x41   :  { %574 = vmatpush.msra.mxu2 %v1713_v31  ;;  %424 = vmatpush.msrb.mxu1 %v1782_v42 }
  0x42   :  { %325 = vmatpush.msra.mxu3 %v1849_v52  ;;  %535 = vmatpush.msra.mxu0 %v1678_v25 }
  0x43   :  { %575 = vmatpush.msra.mxu2 %v1734_v34  ;;  %425 = vmatpush.msrb.mxu1 %v1802_v45 }
  0x44   :  { %326 = vmatpush.msra.mxu3 %v1883_v58  ;;  %1320 = vmatmul.msk.f32.gmra.mxu0 %vm59_vm1, %v1767_v39 }
  0x45   :  { %536 = vmatpush.msra.mxu0 %v1701_v29  ;;  %426 = vmatpush.msrb.mxu1 %v1821_v48 }
  0x46   :  { %327 = vmatpush.msra.mxu3 %v1892_v59  ;;  %576 = vmatpush.msra.mxu2 %v1752_v37 }
  0x47   :  { %427 = vmatpush.msrb.mxu1 %v1841_v51  ;;  %537 = vmatpush.msra.mxu0 %v1720_v32 }
  0x48   :  { %328 = vmatpush.msra.mxu3 %v1901_v60  ;;  %1326 = vmatmul.msk.f32.gmra.mxu1 %vm59_vm1, %v1543_v2 }
  0x49   :  { %548 = vmatpush.msra.mxu1 %v1587_v11  ;;  %577 = vmatpush.msra.mxu2 %v1777_v41 }
  0x4a   :  { %329 = vmatpush.msra.mxu3 %v1911_v61  ;;  %538 = vmatpush.msra.mxu0 %v1739_v35 }
  0x4b   :  { %330 = vmatmul.f32.vlgmr.msra.gmra.mxu3 %v1488_v57  ;;  %549 = vmatpush.msra.mxu1 %v1607_v14 }
  0x4c   :  { %452 = vmatpush.msrb.mxu3 %v1559_v7  ;;  %350 = vmatmul.f32.vlgmr.msrb.gmra.mxu0 %v1488_v57 }
  0x4d   :  { %578 = vmatpush.msra.mxu2 %v1795_v44  ;;  %539 = vmatpush.msra.mxu0 %v1759_v38 }
  0x4e   :  { %453 = vmatpush.msrb.mxu3 %v1576_v9  ;;  %550 = vmatpush.msra.mxu1 %v1635_v19 }
  0x4f   :  { %579 = vmatpush.msra.mxu2 %v1816_v47  ;;  %540 = vmatpush.msra.mxu0 %v1782_v42 }
  0x50   :  { %454 = vmatpush.msrb.mxu3 %v1595_v12  ;;  %551 = vmatpush.msra.mxu1 %v1658_v22 }
  0x51   :  { %1327 = vmatmul.msk.f32.gmra.mxu1 %vm59_vm1, %v1613_v15  ;;  %580 = vmatpush.msra.mxu2 %v1834_v50 }
  0x52   :  { %455 = vmatpush.msrb.mxu3 %v1618_v16  ;;  %552 = vmatpush.msra.mxu1 %v1671_v24 }
  0x53   :  { %541 = vmatpush.msra.mxu0 %v1802_v45  ;;  %581 = vmatpush.msra.mxu2 %v1854_v53 }
  0x54   :  { %456 = vmatpush.msrb.mxu3 %v1650_v21  ;;  %553 = vmatpush.msra.mxu1 %v1695_v28 }
  0x55   :  { %542 = vmatpush.msra.mxu0 %v1821_v48  ;;  %582 = vmatpush.msra.mxu2 %v1862_v54 }
  0x56   :  { %457 = vmatpush.msrb.mxu3 %v1683_v26  ;;  %554 = vmatpush.msra.mxu1 %v1729_v33 }
  0x57   :  { %543 = vmatpush.msra.mxu0 %v1841_v51  ;;  %583 = vmatpush.msra.mxu2 %v1869_v56 }
  0x58   :  { %458 = vmatpush.msrb.mxu3 %v1713_v31  ;;  %555 = vmatpush.msra.mxu1 %v1747_v36 }
  0x59   :  { %1328 = vmatmul.msk.f32.gmra.mxu1 %vm59_vm1, %v1690_v27  ;;  %664 = vmatpush.msrb.mxu0 %v1587_v11 }
  0x5a   :  { %459 = vmatpush.msrb.mxu3 %v1734_v34  ;;  %556 = vmatpush.msra.mxu1 %v1772_v40 }
  0x5b   :  { %665 = vmatpush.msrb.mxu0 %v1607_v14 }
  0x5c   :  { %460 = vmatpush.msrb.mxu3 %v1752_v37  ;;  %557 = vmatpush.msra.mxu1 %v1811_v46 }
  0x5d   :  { %666 = vmatpush.msrb.mxu0 %v1635_v19 }
  0x5e   :  { %461 = vmatpush.msrb.mxu3 %v1777_v41  ;;  %558 = vmatpush.msra.mxu1 %v1829_v49 }
  0x5f   :  { %667 = vmatpush.msrb.mxu0 %v1658_v22 }
  0x60   :  { %462 = vmatpush.msrb.mxu3 %v1795_v44  ;;  %559 = vmatpush.msra.mxu1 %v1849_v52 }
  0x61   :  { %1329 = vmatmul.msk.f32.gmra.mxu1 %vm59_vm1, %v1767_v39  ;;  %668 = vmatpush.msrb.mxu0 %v1671_v24 }
  0x62   :  { %463 = vmatpush.msrb.mxu3 %v1816_v47  ;;  %560 = vmatpush.msra.mxu1 %v1883_v58 }
  0x63   :  { %669 = vmatpush.msrb.mxu0 %v1695_v28 }
  0x64   :  { %464 = vmatpush.msrb.mxu3 %v1834_v50  ;;  %561 = vmatpush.msra.mxu1 %v1892_v59 }
  0x65   :  { %670 = vmatpush.msrb.mxu0 %v1729_v33 }
  0x66   :  { %465 = vmatpush.msrb.mxu3 %v1854_v53  ;;  %562 = vmatpush.msra.mxu1 %v1901_v60 }
  0x67   :  { %671 = vmatpush.msrb.mxu0 %v1747_v36 }
  0x68   :  { %466 = vmatpush.msrb.mxu3 %v1862_v54  ;;  %563 = vmatpush.msra.mxu1 %v1911_v61 }
  0x69   :  { %672 = vmatpush.msrb.mxu0 %v1772_v40 }
  0x6a   :  { %467 = vmatpush.msrb.mxu3 %v1869_v56 }
  0x6b   :  { %673 = vmatpush.msrb.mxu0 %v1811_v46 }
  0x6c   :  { %644 = vmatpush.msra.mxu3 %v1548_v4 }
  0x6d   :  { %674 = vmatpush.msrb.mxu0 %v1829_v49 }
  0x6e   :  { %645 = vmatpush.msra.mxu3 %v1568_v8 }
  0x6f   :  { %675 = vmatpush.msrb.mxu0 %v1849_v52 }
  0x70   :  { %646 = vmatpush.msra.mxu3 %v1581_v10 }
  0x71   :  { %676 = vmatpush.msrb.mxu0 %v1883_v58 }
  0x72   :  { %647 = vmatpush.msra.mxu3 %v1601_v13 }
  0x73   :  { %677 = vmatpush.msrb.mxu0 %v1892_v59 }
  0x74   :  { %648 = vmatpush.msra.mxu3 %v1624_v17 }
  0x75   :  { %678 = vmatpush.msrb.mxu0 %v1901_v60 }
  0x76   :  { %649 = vmatpush.msra.mxu3 %v1644_v20 }
  0x77   :  { %679 = vmatpush.msrb.mxu0 %v1911_v61 }
  0x78   :  { %650 = vmatpush.msra.mxu3 %v1663_v23 }
  0x7a   :  { %651 = vmatpush.msra.mxu3 %v1678_v25 }
  0x7c   :  { %652 = vmatpush.msra.mxu3 %v1701_v29 }
  0x7e   :  { %653 = vmatpush.msra.mxu3 %v1720_v32 }
  0x80   :  { %654 = vmatpush.msra.mxu3 %v1739_v35 }
  0x82   :  { %655 = vmatpush.msra.mxu3 %v1759_v38 }
  0x84   :  { %656 = vmatpush.msra.mxu3 %v1782_v42 }
  0x86   :  { %657 = vmatpush.msra.mxu3 %v1802_v45 }
  0x88   :  { %658 = vmatpush.msra.mxu3 %v1821_v48 }
  0x89   :  { %v108_v62 = vpop.f32.mrf.mxu0 }
  0x8a   :  { %659 = vmatpush.msra.mxu3 %v1841_v51  ;;  %v109_v57 = vadd.f32 %v108_v62, %v45_v1 }
  0x8e   :  { %v2054_v0 = vpop.f32.mrf.mxu3 }
  0x8f   :  { %2758 = vst [vmem:[#allocation15_spill] sm:$0xff] %v2054_v0 }
  0x91   :  { %v111_v2 = vpop.f32.mrf.mxu0 }
  0x92   :  { %v2056_v3 = vadd.f32 %v111_v2, %v45_v1 }
  0x94   :  { %2759 = vst [vmem:[#allocation16_spill] sm:$0xff] %v2056_v3 }
  0x96   :  { %v2058_v5 = vpop.f32.mrf.mxu3 }
  0x97   :  { %2760 = vst [vmem:[#allocation17_spill] sm:$0xff] %v2058_v5  ;;  %v149_v62 = vpop.f32.mrf.mxu1 }
  0x99   :  { %v114_v6 = vpop.f32.mrf.mxu0 }
  0x9a   :  { %v2060_v15 = vadd.f32 %v114_v6, %v45_v1 }
  0x9c   :  { %2761 = vst [vmem:[#allocation18_spill] sm:$0xff] %v2060_v15 }
  0x9e   :  { %v2062_v18 = vpop.f32.mrf.mxu3 }
  0x9f   :  { %2762 = vst [vmem:[#allocation19_spill] sm:$0xff] %v2062_v18 }
  0xa1   :  { %v117_v27 = vpop.f32.mrf.mxu0 }
  0xa2   :  { %v2064_v30 = vadd.f32 %v117_v27, %v45_v1 }
  0xa4   :  { %2763 = vst [vmem:[#allocation20_spill] sm:$0xff] %v2064_v30 }
  0xa6   :  { %v2066_v39 = vpop.f32.mrf.mxu3 }
  0xa7   :  { %2764 = vst [vmem:[#allocation21_spill] sm:$0xff] %v2066_v39  ;;  %v2076_v39 = vperm.slane %v43_v63, 1 }
  0xa9   :  { %v120_v43 = vpop.f32.mrf.mxu0  ;;  %2769 = vst [vmem:[#allocation26_spill] sm:$0xff] %v2076_v39 }
  0xaa   :  { %v2068_v55 = vadd.f32 %v120_v43, %v45_v1 }
  0xac   :  { %2765 = vst [vmem:[#allocation22_spill] sm:$0xff] %v2068_v55 }
  0xae   :  { %v311_v0 = vpop.f32.mrf.mxu3 }
  0xaf   :  { %v354_v61 = vadd.f32 %v311_v0, %v109_v57  ;;  %v150_v0 = vadd.f32 %v149_v62, %v2076_v39 }
  0xb1   :  { %v123_v2 = vpop.f32.mrf.mxu0  ;;  %v1339_v3 = vmul.f32 -1.442695, %v354_v61 }
  0xb2   :  { %v2070_v51 = vadd.f32 %v123_v2, %v45_v1 }
  0xb3   :  { %1359 = vpow2.f32 %v1339_v3 }
  0xb4   :  { %2766 = vst [vmem:[#allocation23_spill] sm:$0xff] %v2070_v51 }
  0xb9   :  { %v126_v6 = vpop.f32.mrf.mxu0  ;;  %v1360_v5 = vpop.eup %1359 }
  0xba   :  { %v2072_v15 = vadd.f32 %v126_v6, %v45_v1  ;;  %v358_v18 = vadd.f32 1.0, %v1360_v5 }
  0xbc   :  { %2767 = vst [vmem:[#allocation24_spill] sm:$0xff] %v2072_v15  ;;  %1361 = vrcp.f32 %v358_v18  ;;  %v370_v5 = vand.u32 2147483648, %v358_v18  ;;  %vm364_vm3 = vweird.f32 %v358_v18  ;;  %v368_v15 = vand.u32 2147483647, %v358_v18 }
  0xbe   :  { %vm369_vm5 = vcmp.eq.f32.partialorder %v368_v15, 8.507059e+37 }
  0xc1   :  { %v129_v27 = vpop.f32.mrf.mxu0 }
  0xc2   :  { %v2074_v30 = vadd.f32 %v129_v27, %v45_v1  ;;  %v1362_v43 = vpop.eup %1361  ;;  %v2082_v1 = vld [vmem:[%s2719_s4] ss:$0 sm:$0xff] }
  0xc3   :  { %v360_v57 = vmul.f32 %v1362_v43, %v358_v18  ;;  %vm365_vm2 = vweird.f32 %v1362_v43 }
  0xc4   :  { %2768 = vst [vmem:[#allocation25_spill] sm:$0xff] %v2074_v30  ;;  %vm366_vm4 = vmor %vm364_vm3, %vm365_vm2 }
  0xc5   :  { %v361_v2 = vsub.f32 1.0, %v360_v57  ;;  %v371_v57 = vor.u32 1.1754944e-38, %v370_v5 }
  0xc7   :  { %v362_v55 = vmul.f32 %v1362_v43, %v361_v2 }
  0xc9   :  { %v363_v6 = vadd.f32 %v1362_v43, %v362_v55  ;;  %v351_v30 = vpop.f32.mrf.mxu0 }
  0xcb   :  { %v367_v62 = vsel %vm366_vm4, %v1362_v43, %v363_v6 }
  0xcc   :  { %v372_v55 = vsel %vm369_vm5, %v371_v57, %v367_v62 }
  0xce   :  { %v331_v61 = vpop.f32.mrf.mxu3 }
  0xcf   :  { %v374_v51 = vadd.f32 %v331_v61, %v150_v0  ;;  %v190_v0 = vpop.f32.mrf.mxu2  ;;  %v2085_v61 = vperm.slane %v43_v63, 2 }
  0xd1   :  { %v1340_v3 = vmul.f32 -1.442695, %v374_v51  ;;  %v397_v51 = vadd.f32 %v2082_v1, %v351_v30  ;;  %v191_v2 = vadd.f32 %v190_v0, %v2085_v61  ;;  %v152_v0 = vpop.f32.mrf.mxu1 }
  0xd3   :  { %1363 = vpow2.f32 %v1340_v3  ;;  %v398_v18 = vmul.f32 %v397_v51, %v372_v55  ;;  %v2777_v55 = vld [vmem:[#allocation14_spill] sm:$0xff] }
  0xd5   :  { %v399_v60 = vadd.f32 %v398_v18, %v191_v2 }
  0xd9   :  { %v1364_v27 = vpop.eup %1363  ;;  %v2141_v18 = vpop.f32.mrf.mxu1 }
  0xda   :  { %v378_v39 = vadd.f32 1.0, %v1364_v27  ;;  %2778 = vst [vmem:[#allocation28_spill] sm:$0xff] %v2141_v18  ;;  %v2787_v18 = vld [vmem:[#allocation26_spill] sm:$0xff] }
  0xdc   :  { %1365 = vrcp.f32 %v378_v39  ;;  %v390_v54 = vand.u32 2147483648, %v378_v39  ;;  %v388_v43 = vand.u32 2147483647, %v378_v39  ;;  %vm384_vm7 = vweird.f32 %v378_v39 }
  0xdd   :  { %1367 = vtanh.f32 %v399_v60  ;;  %v2775_v60 = vld [vmem:[#allocation10_spill] sm:$0xff] }
  0xde   :  { %v391_v30 = vor.u32 1.1754944e-38, %v390_v54  ;;  %vm389_vm9 = vcmp.eq.f32.partialorder %v388_v43, 8.507059e+37  ;;  %v2772_v54 = vld [vmem:[#allocation9_spill] sm:$0xff] }
  0xe1   :  { %v2143_v2 = vpop.f32.mrf.mxu1 }
  0xe2   :  { %v1366_v3 = vpop.eup %1365  ;;  %2779 = vst [vmem:[#allocation29_spill] sm:$0xff] %v2143_v2 }
  0xe3   :  { %v380_v56 = vmul.f32 %v1366_v3, %v378_v39  ;;  %vm385_vm6 = vweird.f32 %v1366_v3  ;;  %v1368_v27 = vpop.eup %1367  ;;  %v2776_v39 = vld [vmem:[#allocation7_spill] sm:$0xff] }
  0xe4   :  { %vm386_vm8 = vmor %vm384_vm7, %vm385_vm6 }
  0xe5   :  { %v381_v48 = vsub.f32 1.0, %v380_v56  ;;  %v2773_v56 = vld [vmem:[#allocation6_spill] sm:$0xff] }
  0xe7   :  { %v382_v59 = vmul.f32 %v1366_v3, %v381_v48  ;;  %v2771_v48 = vld [vmem:[#allocation12_spill] sm:$0xff] }
  0xe9   :  { %v383_v15 = vadd.f32 %v1366_v3, %v382_v59  ;;  %v2774_v59 = vld [vmem:[#allocation13_spill] sm:$0xff] }
  0xeb   :  { %v387_v6 = vsel %vm386_vm8, %v1366_v3, %v383_v15  ;;  %v2145_v3 = vpop.f32.mrf.mxu1  ;;  %v193_v15 = vpop.f32.mrf.mxu2 }
  0xec   :  { %v392_v63 = vsel %vm389_vm9, %v391_v30, %v387_v6  ;;  %2780 = vst [vmem:[#allocation30_spill] sm:$0xff] %v2145_v3 }
  0xed   :  { %v401_v5 = vsub.f32 1.0, %v392_v63  ;;  %v403_v57 = vmul.f32 0.0, %v392_v63 }
  0xef   :  { %v402_v62 = vmul.f32 %v1368_v27, %v401_v5 }
  0xf1   :  { %v2088_v51 = vadd.f32 %v403_v57, %v402_v62  ;;  %v2786_v62 = vld [vmem:[#allocation16_spill] sm:$0xff] }
  0xf3   :  { %2770 = vst [vmem:[#allocation27_spill] sm:$0xff] %v2088_v51  ;;  %428 = vmatmul.f32.vlgmr.msrb.gmra.mxu1 %v2088_v51  ;;  %448 = vmatmul.f32.vlgmr.msrb.gmra.mxu2 %v2088_v51  ;;  %v2147_v43 = vpop.f32.mrf.mxu1  ;;  %v2151_v6 = vpop.f32.mrf.mxu2 }
  0xf4   :  { %468 = vmatmul.f32.vlgmr.msrb.gmra.mxu3 %v2088_v51  ;;  %684 = vmatpush.msrb.mxu1 %v1559_v7  ;;  %2781 = vst [vmem:[#allocation31_spill] sm:$0xff] %v2147_v43 }
  0xf5   :  { %760 = vmatpush.msrb.mxu2 %v1548_v4  ;;  %780 = vmatpush.msrb.mxu3 %v1587_v11  ;;  %2783 = vst [vmem:[#allocation33_spill] sm:$0xff] %v2151_v6 }
  0xf6   :  { %685 = vmatpush.msrb.mxu1 %v1576_v9 }
  0xf7   :  { %761 = vmatpush.msrb.mxu2 %v1568_v8  ;;  %781 = vmatpush.msrb.mxu3 %v1607_v14 }
  0xf8   :  { %686 = vmatpush.msrb.mxu1 %v1595_v12 }
  0xf9   :  { %762 = vmatpush.msrb.mxu2 %v1581_v10  ;;  %782 = vmatpush.msrb.mxu3 %v1635_v19 }
  0xfa   :  { %687 = vmatpush.msrb.mxu1 %v1618_v16 }
  0xfb   :  { %763 = vmatpush.msrb.mxu2 %v1601_v13  ;;  %783 = vmatpush.msrb.mxu3 %v1658_v22  ;;  %v2149_v30 = vpop.f32.mrf.mxu1  ;;  %v2155_v5 = vpop.f32.mrf.mxu2 }
  0xfc   :  { %688 = vmatpush.msrb.mxu1 %v1650_v21  ;;  %2782 = vst [vmem:[#allocation32_spill] sm:$0xff] %v2149_v30 }
  0xfd   :  { %764 = vmatpush.msrb.mxu2 %v1624_v17  ;;  %784 = vmatpush.msrb.mxu3 %v1671_v24  ;;  %2785 = vst [vmem:[#allocation35_spill] sm:$0xff] %v2155_v5 }
  0xfe   :  { %689 = vmatpush.msrb.mxu1 %v1683_v26 }
  0xff   :  { %765 = vmatpush.msrb.mxu2 %v1644_v20  ;;  %785 = vmatpush.msrb.mxu3 %v1695_v28 }
 0x100   :  { %690 = vmatpush.msrb.mxu1 %v1713_v31 }
 0x101   :  { %766 = vmatpush.msrb.mxu2 %v1663_v23  ;;  %786 = vmatpush.msrb.mxu3 %v1729_v33 }
 0x102   :  { %691 = vmatpush.msrb.mxu1 %v1734_v34 }
 0x103   :  { %767 = vmatpush.msrb.mxu2 %v1678_v25  ;;  %787 = vmatpush.msrb.mxu3 %v1747_v36  ;;  %v2153_v63 = vpop.f32.mrf.mxu1 }
 0x104   :  { %692 = vmatpush.msrb.mxu1 %v1752_v37  ;;  %2784 = vst [vmem:[#allocation34_spill] sm:$0xff] %v2153_v63 }
 0x105   :  { %768 = vmatpush.msrb.mxu2 %v1701_v29  ;;  %788 = vmatpush.msrb.mxu3 %v1772_v40 }
 0x106   :  { %693 = vmatpush.msrb.mxu1 %v1777_v41 }
 0x107   :  { %769 = vmatpush.msrb.mxu2 %v1720_v32  ;;  %789 = vmatpush.msrb.mxu3 %v1811_v46 }
 0x108   :  { %694 = vmatpush.msrb.mxu1 %v1795_v44 }
 0x109   :  { %770 = vmatpush.msrb.mxu2 %v1739_v35  ;;  %790 = vmatpush.msrb.mxu3 %v1829_v49 }
 0x10a   :  { %695 = vmatpush.msrb.mxu1 %v1816_v47 }
 0x10b   :  { %771 = vmatpush.msrb.mxu2 %v1759_v38  ;;  %791 = vmatpush.msrb.mxu3 %v1849_v52 }
 0x10c   :  { %696 = vmatpush.msrb.mxu1 %v1834_v50 }
 0x10d   :  { %772 = vmatpush.msrb.mxu2 %v1782_v42  ;;  %792 = vmatpush.msrb.mxu3 %v1883_v58 }
 0x10e   :  { %697 = vmatpush.msrb.mxu1 %v1854_v53 }
 0x10f   :  { %773 = vmatpush.msrb.mxu2 %v1802_v45  ;;  %793 = vmatpush.msrb.mxu3 %v2771_v48 }
 0x110   :  { %698 = vmatpush.msrb.mxu1 %v2772_v54 }
 0x111   :  { %774 = vmatpush.msrb.mxu2 %v2773_v56  ;;  %794 = vmatpush.msrb.mxu3 %v2774_v59 }
 0x112   :  { %699 = vmatpush.msrb.mxu1 %v2775_v60 }
 0x113   :  { %775 = vmatpush.msrb.mxu2 %v2776_v39  ;;  %795 = vmatpush.msrb.mxu3 %v2777_v55  ;;  %v153_v39 = vadd.f32 %v152_v0, %v2787_v18 }
 0x170   :  { %v429_v27 = vpop.f32.mrf.mxu1 }
 0x171   :  { %v472_v57 = vadd.f32 %v429_v27, %v2786_v62 }
 0x173   :  { %v1341_v55 = vmul.f32 -1.442695, %v472_v57 }
 0x175   :  { %1369 = vpow2.f32 %v1341_v55 }
 0x176   :  { %v449_v2 = vpop.f32.mrf.mxu2 }
 0x177   :  { %v492_v3 = vadd.f32 %v449_v2, %v153_v39  ;;  %v469_v0 = vpop.f32.mrf.mxu3 }
 0x179   :  { %v1342_v60 = vmul.f32 -1.442695, %v492_v3  ;;  %v512_v3 = vadd.f32 %v2082_v1, %v469_v0 }
 0x17b   :  { %v1370_v43 = vpop.eup %1369  ;;  %1371 = vpow2.f32 %v1342_v60 }
 0x17c   :  { %v476_v59 = vadd.f32 1.0, %v1370_v43  ;;  %v194_v43 = vadd.f32 %v193_v15, %v2085_v61 }
 0x17e   :  { %1373 = vrcp.f32 %v476_v59  ;;  %v488_v54 = vand.u32 2147483648, %v476_v59  ;;  %v486_v27 = vand.u32 2147483647, %v476_v59  ;;  %vm482_vm11 = vweird.f32 %v476_v59 }
 0x180   :  { %v489_v39 = vor.u32 1.1754944e-38, %v488_v54  ;;  %vm487_vm13 = vcmp.eq.f32.partialorder %v486_v27, 8.507059e+37 }
 0x181   :  { %v1372_v30 = vpop.eup %1371 }
 0x182   :  { %v496_v6 = vadd.f32 1.0, %v1372_v30 }
 0x184   :  { %v1374_v56 = vpop.eup %1373  ;;  %1375 = vrcp.f32 %v496_v6  ;;  %v506_v45 = vand.u32 2147483647, %v496_v6  ;;  %vm502_vm15 = vweird.f32 %v496_v6 }
 0x185   :  { %v478_v63 = vmul.f32 %v1374_v56, %v476_v59  ;;  %vm483_vm10 = vweird.f32 %v1374_v56 }
 0x186   :  { %vm484_vm12 = vmor %vm482_vm11, %vm483_vm10  ;;  %vm507_vm1 = vcmp.eq.f32.partialorder %v506_v45, 8.507059e+37 }
 0x187   :  { %v479_v5 = vsub.f32 1.0, %v478_v63 }
 0x189   :  { %v480_v48 = vmul.f32 %v1374_v56, %v479_v5  ;;  %v508_v5 = vand.u32 2147483648, %v496_v6 }
 0x18a   :  { %v1376_v62 = vpop.eup %1375 }
 0x18b   :  { %v498_v55 = vmul.f32 %v1376_v62, %v496_v6  ;;  %v481_v57 = vadd.f32 %v1374_v56, %v480_v48  ;;  %vm503_vm14 = vweird.f32 %v1376_v62  ;;  %v509_v48 = vor.u32 1.1754944e-38, %v508_v5 }
 0x18c   :  { %vm504_vm0 = vmor %vm502_vm15, %vm503_vm14 }
 0x18d   :  { %v499_v60 = vsub.f32 1.0, %v498_v55  ;;  %v485_v2 = vsel %vm484_vm12, %v1374_v56, %v481_v57 }
 0x18e   :  { %v490_v30 = vsel %vm487_vm13, %v489_v39, %v485_v2 }
 0x18f   :  { %v500_v63 = vmul.f32 %v1376_v62, %v499_v60  ;;  %v513_v18 = vmul.f32 %v512_v3, %v490_v30 }
 0x191   :  { %v501_v53 = vadd.f32 %v1376_v62, %v500_v63  ;;  %v514_v58 = vadd.f32 %v513_v18, %v194_v43 }
 0x193   :  { %v505_v59 = vsel %vm504_vm0, %v1376_v62, %v501_v53  ;;  %1377 = vtanh.f32 %v514_v58  ;;  %v2802_v62 = vld [vmem:[#allocation33_spill] sm:$0xff] }
 0x194   :  { %v510_v54 = vsel %vm507_vm1, %v509_v48, %v505_v59  ;;  %v197_v57 = vadd.f32 %v2802_v62, %v2085_v61 }
 0x195   :  { %v516_v56 = vsub.f32 1.0, %v510_v54  ;;  %v518_v15 = vmul.f32 %v510_v54, %v2088_v51 }
 0x199   :  { %v1378_v27 = vpop.eup %1377 }
 0x19a   :  { %v517_v0 = vmul.f32 %v1378_v27, %v516_v56  ;;  %v2230_v27 = vld [vmem:[%s2718_s2 + $0x178] sm:$0xff] }
 0x19c   :  { %v2162_v55 = vadd.f32 %v518_v15, %v517_v0  ;;  %v2236_v0 = vld [vmem:[%s2718_s2 + $0x168] sm:$0xff]  ;;  %v2242_v15 = vld [vmem:[%s2718_s2 + $0x170] sm:$0xff] }
 0x19e   :  { %2788 = vst [vmem:[#allocation16_spill] sm:$0xff] %v2162_v55  ;;  %544 = vmatmul.f32.vlgmr.msra.gmra.mxu0 %v2162_v55  ;;  %564 = vmatmul.f32.vlgmr.msra.gmra.mxu1 %v2162_v55 }
 0x19f   :  { %584 = vmatmul.f32.vlgmr.msra.gmra.mxu2 %v2162_v55  ;;  %800 = vmatpush.msra.mxu0 %v1559_v7  ;;  %v2790_v7 = vld [vmem:[#allocation8_spill] sm:$0xff] }
 0x1a0   :  { %876 = vmatpush.msra.mxu1 %v1548_v4  ;;  %896 = vmatpush.msra.mxu2 %v1587_v11  ;;  %v2789_v4 = vld [vmem:[#allocation11_spill] sm:$0xff]  ;;  %v2794_v11 = vld [vmem:[#allocation6_spill] sm:$0xff] }
 0x1a1   :  { %801 = vmatpush.msra.mxu0 %v1576_v9  ;;  %v2792_v9 = vld [vmem:[#allocation12_spill] sm:$0xff] }
 0x1a2   :  { %877 = vmatpush.msra.mxu1 %v1568_v8  ;;  %897 = vmatpush.msra.mxu2 %v1607_v14  ;;  %v2791_v8 = vld [vmem:[#allocation5_spill] sm:$0xff]  ;;  %v2797_v14 = vld [vmem:[#allocation7_spill] sm:$0xff] }
 0x1a3   :  { %802 = vmatpush.msra.mxu0 %v1595_v12  ;;  %v2795_v12 = vld [vmem:[#allocation13_spill] sm:$0xff] }
 0x1a4   :  { %878 = vmatpush.msra.mxu1 %v1581_v10  ;;  %898 = vmatpush.msra.mxu2 %v1635_v19  ;;  %v2793_v10 = vld [vmem:[#allocation9_spill] sm:$0xff]  ;;  %v2800_v19 = vld [vmem:[#allocation28_spill] sm:$0xff] }
 0x1a5   :  { %803 = vmatpush.msra.mxu0 %v1618_v16  ;;  %v2798_v16 = vld [vmem:[#allocation14_spill] sm:$0xff] }
 0x1a6   :  { %879 = vmatpush.msra.mxu1 %v1601_v13  ;;  %899 = vmatpush.msra.mxu2 %v1658_v22  ;;  %v2796_v13 = vld [vmem:[#allocation10_spill] sm:$0xff] }
 0x1a7   :  { %804 = vmatpush.msra.mxu0 %v1650_v21 }
 0x1a8   :  { %880 = vmatpush.msra.mxu1 %v1624_v17  ;;  %900 = vmatpush.msra.mxu2 %v1671_v24  ;;  %v2799_v17 = vld [vmem:[#allocation26_spill] sm:$0xff] }
 0x1a9   :  { %805 = vmatpush.msra.mxu0 %v1683_v26 }
 0x1aa   :  { %881 = vmatpush.msra.mxu1 %v1644_v20  ;;  %901 = vmatpush.msra.mxu2 %v1695_v28  ;;  %v156_v20 = vadd.f32 %v2800_v19, %v2799_v17  ;;  %v2266_v19 = vld [vmem:[%s2718_s2 + $0x148] sm:$0xff] }
 0x1ab   :  { %806 = vmatpush.msra.mxu0 %v1713_v31 }
 0x1ac   :  { %882 = vmatpush.msra.mxu1 %v1663_v23  ;;  %902 = vmatpush.msra.mxu2 %v1729_v33  ;;  %v2801_v23 = vld [vmem:[#allocation18_spill] sm:$0xff] }
 0x1ad   :  { %807 = vmatpush.msra.mxu0 %v1734_v34 }
 0x1ae   :  { %883 = vmatpush.msra.mxu1 %v1678_v25  ;;  %903 = vmatpush.msra.mxu2 %v1747_v36 }
 0x1af   :  { %808 = vmatpush.msra.mxu0 %v1752_v37 }
 0x1b0   :  { %884 = vmatpush.msra.mxu1 %v1701_v29  ;;  %904 = vmatpush.msra.mxu2 %v1772_v40 }
 0x1b1   :  { %809 = vmatpush.msra.mxu0 %v1777_v41 }
 0x1b2   :  { %885 = vmatpush.msra.mxu1 %v1720_v32  ;;  %905 = vmatpush.msra.mxu2 %v1811_v46 }
 0x1b3   :  { %810 = vmatpush.msra.mxu0 %v1795_v44 }
 0x1b4   :  { %886 = vmatpush.msra.mxu1 %v1739_v35  ;;  %906 = vmatpush.msra.mxu2 %v1829_v49 }
 0x1b5   :  { %811 = vmatpush.msra.mxu0 %v1816_v47 }
 0x1b6   :  { %887 = vmatpush.msra.mxu1 %v1759_v38  ;;  %907 = vmatpush.msra.mxu2 %v1849_v52 }
 0x1b7   :  { %812 = vmatpush.msra.mxu0 %v1834_v50 }
 0x1b8   :  { %888 = vmatpush.msra.mxu1 %v1782_v42  ;;  %908 = vmatpush.msra.mxu2 %v2789_v4 }
 0x1b9   :  { %813 = vmatpush.msra.mxu0 %v2790_v7 }
 0x1ba   :  { %889 = vmatpush.msra.mxu1 %v2791_v8  ;;  %909 = vmatpush.msra.mxu2 %v2792_v9  ;;  %v2248_v8 = vld [vmem:[%s2718_s2 + $0x160] sm:$0xff] }
 0x1bb   :  { %814 = vmatpush.msra.mxu0 %v2793_v10 }
 0x1bc   :  { %890 = vmatpush.msra.mxu1 %v2794_v11  ;;  %910 = vmatpush.msra.mxu2 %v2795_v12  ;;  %v2254_v11 = vld [vmem:[%s2718_s2 + $0x150] sm:$0xff] }
 0x1bd   :  { %815 = vmatpush.msra.mxu0 %v2796_v13 }
 0x1be   :  { %891 = vmatpush.msra.mxu1 %v2797_v14  ;;  %911 = vmatpush.msra.mxu2 %v2798_v16  ;;  %v2260_v14 = vld [vmem:[%s2718_s2 + $0x158] sm:$0xff] }
 0x21b   :  { %v545_v21 = vpop.f32.mrf.mxu0  ;;  %v565_v22 = vpop.f32.mrf.mxu1 }
 0x21c   :  { %v588_v24 = vadd.f32 %v545_v21, %v2801_v23  ;;  %v608_v25 = vadd.f32 %v565_v22, %v156_v20  ;;  %v2272_v20 = vld [vmem:[%s2718_s2 + $0x138] sm:$0xff]  ;;  %v2278_v21 = vld [vmem:[%s2718_s2 + $0x140] sm:$0xff]  ;;  %v2284_v22 = vld [vmem:[%s2718_s2 + $0x130] sm:$0xff] }
 0x21d   :  { %v2290_v23 = vld [vmem:[%s2718_s2 + $0x120] sm:$0xff] }
 0x21e   :  { %v1343_v26 = vmul.f32 -1.442695, %v588_v24  ;;  %v1344_v28 = vmul.f32 -1.442695, %v608_v25  ;;  %v2296_v24 = vld [vmem:[%s2718_s2 + $0x128] sm:$0xff]  ;;  %v2302_v25 = vld [vmem:[%s2718_s2 + $0x118] sm:$0xff] }
 0x220   :  { %1379 = vpow2.f32 %v1343_v26  ;;  %v2308_v26 = vld [vmem:[%s2718_s2 + $0x108] sm:$0xff] }
 0x221   :  { %1381 = vpow2.f32 %v1344_v28  ;;  %v2314_v28 = vld [vmem:[%s2718_s2 + $0x110] sm:$0xff] }
 0x222   :  { %v585_v46 = vpop.f32.mrf.mxu2 }
 0x223   :  { %v628_v58 = vadd.f32 %v2082_v1, %v585_v46  ;;  %v2404_v46 = vld [vmem:[%s2718_s2 + $0x98] sm:$0xff] }
 0x226   :  { %v1380_v29 = vpop.eup %1379 }
 0x227   :  { %v1382_v31 = vpop.eup %1381  ;;  %v592_v32 = vadd.f32 1.0, %v1380_v29  ;;  %v2320_v29 = vld [vmem:[%s2718_s2 + $0x100] sm:$0xff] }
 0x228   :  { %v612_v33 = vadd.f32 1.0, %v1382_v31  ;;  %v2326_v31 = vld [vmem:[%s2718_s2 + $0xf0] sm:$0xff] }
 0x229   :  { %1383 = vrcp.f32 %v592_v32  ;;  %v604_v41 = vand.u32 2147483648, %v592_v32  ;;  %v602_v44 = vand.u32 2147483647, %v592_v32  ;;  %vm598_vm3 = vweird.f32 %v592_v32 }
 0x22a   :  { %1385 = vrcp.f32 %v612_v33  ;;  %v624_v39 = vand.u32 2147483648, %v612_v33  ;;  %vm618_vm7 = vweird.f32 %v612_v33  ;;  %v622_v2 = vand.u32 2147483647, %v612_v33 }
 0x22b   :  { %v605_v50 = vor.u32 1.1754944e-38, %v604_v41  ;;  %vm603_vm5 = vcmp.eq.f32.partialorder %v602_v44, 8.507059e+37  ;;  %v2380_v41 = vld [vmem:[%s2718_s2 + $0xa8] sm:$0xff]  ;;  %v2392_v44 = vld [vmem:[%s2718_s2 + $0xa0] sm:$0xff] }
 0x22c   :  { %v625_v30 = vor.u32 1.1754944e-38, %v624_v39  ;;  %vm623_vm9 = vcmp.eq.f32.partialorder %v622_v2, 8.507059e+37 }
 0x22f   :  { %v1384_v34 = vpop.eup %1383 }
 0x230   :  { %v1386_v35 = vpop.eup %1385  ;;  %v594_v36 = vmul.f32 %v1384_v34, %v592_v32  ;;  %vm599_vm2 = vweird.f32 %v1384_v34  ;;  %v2332_v32 = vld [vmem:[%s2718_s2 + $0xf8] sm:$0xff] }
 0x231   :  { %v614_v37 = vmul.f32 %v1386_v35, %v612_v33  ;;  %vm600_vm4 = vmor %vm598_vm3, %vm599_vm2  ;;  %vm619_vm6 = vweird.f32 %v1386_v35  ;;  %v2338_v33 = vld [vmem:[%s2718_s2 + $0xe8] sm:$0xff] }
 0x232   :  { %v595_v38 = vsub.f32 1.0, %v594_v36  ;;  %vm620_vm8 = vmor %vm618_vm7, %vm619_vm6  ;;  %v2356_v36 = vld [vmem:[%s2718_s2 + $0xd0] sm:$0xff] }
 0x233   :  { %v615_v40 = vsub.f32 1.0, %v614_v37  ;;  %v2362_v37 = vld [vmem:[%s2718_s2 + $0xc0] sm:$0xff] }
 0x234   :  { %v596_v42 = vmul.f32 %v1384_v34, %v595_v38  ;;  %v2368_v38 = vld [vmem:[%s2718_s2 + $0xc8] sm:$0xff] }
 0x235   :  { %v616_v45 = vmul.f32 %v1386_v35, %v615_v40  ;;  %v2374_v40 = vld [vmem:[%s2718_s2 + $0xb8] sm:$0xff] }
 0x236   :  { %v597_v47 = vadd.f32 %v1384_v34, %v596_v42  ;;  %v2386_v42 = vld [vmem:[%s2718_s2 + $0xb0] sm:$0xff] }
 0x237   :  { %v617_v18 = vadd.f32 %v1386_v35, %v616_v45  ;;  %v2398_v45 = vld [vmem:[%s2718_s2 + $0x90] sm:$0xff] }
 0x238   :  { %v601_v53 = vsel %vm600_vm4, %v1384_v34, %v597_v47  ;;  %v2344_v34 = vld [vmem:[%s2718_s2 + $0xd8] sm:$0xff]  ;;  %v2410_v47 = vld [vmem:[%s2718_s2 + $0x88] sm:$0xff] }
 0x239   :  { %v606_v6 = vsel %vm603_vm5, %v605_v50, %v601_v53  ;;  %v621_v43 = vsel %vm620_vm8, %v1386_v35, %v617_v18  ;;  %v2350_v35 = vld [vmem:[%s2718_s2 + $0xe0] sm:$0xff]  ;;  %v2416_v50 = vld [vmem:[%s2718_s2 + $0x78] sm:$0xff]  ;;  %v2423_v53 = vld [vmem:[%s2718_s2 + $0x70] sm:$0xff] }
 0x23a   :  { %v629_v60 = vmul.f32 %v628_v58, %v606_v6  ;;  %v626_v63 = vsel %vm623_vm9, %v625_v30, %v621_v43  ;;  %v2429_v58 = vld [vmem:[%s2718_s2 + $0x60] sm:$0xff]  ;;  %v2442_v18 = vld [vmem:[%s2718_s2 + $0x48] sm:$0xff]  ;;  %v2458_v6 = vld [vmem:[%s2718_s2 + $0x18] sm:$0xff] }
 0x23b   :  { %v632_v5 = vsub.f32 1.0, %v626_v63  ;;  %v634_v54 = vmul.f32 %v626_v63, %v2162_v55 }
 0x23c   :  { %v630_v3 = vadd.f32 %v629_v60, %v197_v57 }
 0x23e   :  { %1387 = vtanh.f32 %v630_v3 }
 0x244   :  { %v1388_v48 = vpop.eup %1387 }
 0x245   :  { %v633_v59 = vmul.f32 %v1388_v48, %v632_v5 }
 0x247   :  { %v2222_v56 = vadd.f32 %v634_v54, %v633_v59 }
 0x249   :  { %660 = vmatmul.f32.vlgmr.msra.gmra.mxu3 %v2222_v56  ;;  %680 = vmatmul.f32.vlgmr.msrb.gmra.mxu0 %v2222_v56 }
 0x24a   :  { %700 = vmatmul.f32.vlgmr.msrb.gmra.mxu1 %v2222_v56  ;;  %916 = vmatpush.msra.mxu3 %v2230_v27 }
 0x24b   :  { %992 = vmatpush.msrb.mxu0 %v2236_v0  ;;  %1012 = vmatpush.msrb.mxu1 %v2242_v15 }
 0x24c   :  { %917 = vmatpush.msra.mxu3 %v2248_v8 }
 0x24d   :  { %993 = vmatpush.msrb.mxu0 %v2254_v11  ;;  %1013 = vmatpush.msrb.mxu1 %v2260_v14 }
 0x24e   :  { %918 = vmatpush.msra.mxu3 %v2266_v19 }
 0x24f   :  { %994 = vmatpush.msrb.mxu0 %v2272_v20  ;;  %1014 = vmatpush.msrb.mxu1 %v2278_v21 }
 0x250   :  { %919 = vmatpush.msra.mxu3 %v2284_v22 }
 0x251   :  { %995 = vmatpush.msrb.mxu0 %v2290_v23  ;;  %1015 = vmatpush.msrb.mxu1 %v2296_v24 }
 0x252   :  { %920 = vmatpush.msra.mxu3 %v2302_v25 }
 0x253   :  { %996 = vmatpush.msrb.mxu0 %v2308_v26  ;;  %1016 = vmatpush.msrb.mxu1 %v2314_v28 }
 0x254   :  { %921 = vmatpush.msra.mxu3 %v2320_v29 }
 0x255   :  { %997 = vmatpush.msrb.mxu0 %v2326_v31  ;;  %1017 = vmatpush.msrb.mxu1 %v2332_v32 }
 0x256   :  { %922 = vmatpush.msra.mxu3 %v2338_v33 }
 0x257   :  { %998 = vmatpush.msrb.mxu0 %v2344_v34  ;;  %1018 = vmatpush.msrb.mxu1 %v2350_v35 }
 0x258   :  { %923 = vmatpush.msra.mxu3 %v2356_v36 }
 0x259   :  { %999 = vmatpush.msrb.mxu0 %v2362_v37  ;;  %1019 = vmatpush.msrb.mxu1 %v2368_v38 }
 0x25a   :  { %924 = vmatpush.msra.mxu3 %v2374_v40 }
 0x25b   :  { %1000 = vmatpush.msrb.mxu0 %v2380_v41  ;;  %1020 = vmatpush.msrb.mxu1 %v2386_v42 }
 0x25c   :  { %925 = vmatpush.msra.mxu3 %v2392_v44 }
 0x25d   :  { %1001 = vmatpush.msrb.mxu0 %v2398_v45  ;;  %1021 = vmatpush.msrb.mxu1 %v2404_v46 }
 0x25e   :  { %926 = vmatpush.msra.mxu3 %v2410_v47 }
 0x25f   :  { %1002 = vmatpush.msrb.mxu0 %v2416_v50  ;;  %1022 = vmatpush.msrb.mxu1 %v1829_v49  ;;  %v2436_v49 = vld [vmem:[%s2718_s2 + $0x58] sm:$0xff] }
 0x260   :  { %927 = vmatpush.msra.mxu3 %v2423_v53 }
 0x261   :  { %1003 = vmatpush.msrb.mxu0 %v2429_v58  ;;  %1023 = vmatpush.msrb.mxu1 %v1849_v52  ;;  %v2450_v52 = vld [vmem:[%s2718_s2 + $0x30] sm:$0xff] }
 0x262   :  { %928 = vmatpush.msra.mxu3 %v2436_v49 }
 0x263   :  { %1004 = vmatpush.msrb.mxu0 %v2442_v18  ;;  %1024 = vmatpush.msrb.mxu1 %v2789_v4  ;;  %v2466_v4 = vld [vmem:[%s2718_s2] sm:$0xff] }
 0x264   :  { %929 = vmatpush.msra.mxu3 %v2790_v7  ;;  %v2803_v7 = vld [vmem:[#allocation29_spill] sm:$0xff] }
 0x265   :  { %1005 = vmatpush.msrb.mxu0 %v2450_v52  ;;  %1025 = vmatpush.msrb.mxu1 %v2792_v9  ;;  %v159_v9 = vadd.f32 %v2803_v7, %v2799_v17 }
 0x266   :  { %930 = vmatpush.msra.mxu3 %v2793_v10 }
 0x267   :  { %1006 = vmatpush.msrb.mxu0 %v2458_v6  ;;  %1026 = vmatpush.msrb.mxu1 %v2795_v12  ;;  %v2804_v12 = vld [vmem:[#allocation20_spill] sm:$0xff] }
 0x268   :  { %931 = vmatpush.msra.mxu3 %v2796_v13 }
 0x269   :  { %1007 = vmatpush.msrb.mxu0 %v2466_v4  ;;  %1027 = vmatpush.msrb.mxu1 %v2798_v16 }
 0x2c6   :  { %v681_v10 = vpop.f32.mrf.mxu0 }
 0x2c7   :  { %v724_v62 = vadd.f32 %v681_v10, %v159_v9 }
 0x2c9   :  { %v1346_v57 = vmul.f32 -1.442695, %v724_v62 }
 0x2cb   :  { %1389 = vpow2.f32 %v1346_v57  ;;  %v701_v57 = vpop.f32.mrf.mxu1 }
 0x2cc   :  { %v661_v39 = vpop.f32.mrf.mxu3 }
 0x2cd   :  { %v704_v60 = vadd.f32 %v661_v39, %v2804_v12 }
 0x2cf   :  { %v1345_v13 = vmul.f32 -1.442695, %v704_v60  ;;  %v744_v60 = vadd.f32 %v2082_v1, %v701_v57 }
 0x2d1   :  { %v1390_v2 = vpop.eup %1389  ;;  %1391 = vpow2.f32 %v1345_v13 }
 0x2d2   :  { %v728_v3 = vadd.f32 1.0, %v1390_v2 }
 0x2d4   :  { %1393 = vrcp.f32 %v728_v3  ;;  %v740_v55 = vand.u32 2147483648, %v728_v3  ;;  %vm734_vm15 = vweird.f32 %v728_v3  ;;  %v738_v51 = vand.u32 2147483647, %v728_v3 }
 0x2d6   :  { %vm739_vm1 = vcmp.eq.f32.partialorder %v738_v51, 8.507059e+37  ;;  %v1478_v51 = vld [vmem:[%s2718_s2 + $0x80] sm:$0xff] }
 0x2d7   :  { %v1392_v43 = vpop.eup %1391 }
 0x2d8   :  { %v708_v30 = vadd.f32 1.0, %v1392_v43 }
 0x2da   :  { %1395 = vrcp.f32 %v708_v30  ;;  %v1394_v63 = vpop.eup %1393  ;;  %v720_v7 = vand.u32 2147483648, %v708_v30  ;;  %v718_v10 = vand.u32 2147483647, %v708_v30  ;;  %vm714_vm11 = vweird.f32 %v708_v30 }
 0x2db   :  { %v730_v16 = vmul.f32 %v1394_v63, %v728_v3  ;;  %vm735_vm14 = vweird.f32 %v1394_v63 }
 0x2dc   :  { %v721_v12 = vor.u32 1.1754944e-38, %v720_v7  ;;  %vm719_vm13 = vcmp.eq.f32.partialorder %v718_v10, 8.507059e+37  ;;  %vm736_vm0 = vmor %vm734_vm15, %vm735_vm14 }
 0x2dd   :  { %v731_v59 = vsub.f32 1.0, %v730_v16  ;;  %v2805_v16 = vld [vmem:[#allocation35_spill] sm:$0xff] }
 0x2df   :  { %v732_v62 = vmul.f32 %v1394_v63, %v731_v59 }
 0x2e0   :  { %v1396_v5 = vpop.eup %1395 }
 0x2e1   :  { %v710_v48 = vmul.f32 %v1396_v5, %v708_v30  ;;  %vm715_vm10 = vweird.f32 %v1396_v5  ;;  %v733_v2 = vadd.f32 %v1394_v63, %v732_v62  ;;  %v741_v30 = vor.u32 1.1754944e-38, %v740_v55  ;;  %v1479_v55 = vld [vmem:[%s2718_s2 + $0x68] sm:$0xff] }
 0x2e2   :  { %vm716_vm12 = vmor %vm714_vm11, %vm715_vm10 }
 0x2e3   :  { %v711_v54 = vsub.f32 1.0, %v710_v48  ;;  %v200_v48 = vadd.f32 %v2805_v16, %v2085_v61 }
 0x2e5   :  { %v712_v9 = vmul.f32 %v1396_v5, %v711_v54 }
 0x2e7   :  { %v713_v39 = vadd.f32 %v1396_v5, %v712_v9  ;;  %v737_v9 = vsel %vm736_vm0, %v1394_v63, %v733_v2 }
 0x2e8   :  { %v742_v7 = vsel %vm739_vm1, %v741_v30, %v737_v9  ;;  %v2808_v9 = vld [vmem:[#allocation15_spill] sm:$0xff] }
 0x2e9   :  { %v717_v13 = vsel %vm716_vm12, %v1396_v5, %v713_v39  ;;  %v748_v57 = vsub.f32 1.0, %v742_v7  ;;  %v750_v62 = vmul.f32 %v742_v7, %v2222_v56  ;;  %v203_v30 = vadd.f32 %v2808_v9, %v2085_v61 }
 0x2ea   :  { %v722_v43 = vsel %vm719_vm13, %v721_v12, %v717_v13 }
 0x2eb   :  { %v745_v54 = vmul.f32 %v744_v60, %v722_v43 }
 0x2ed   :  { %v746_v59 = vadd.f32 %v745_v54, %v200_v48 }
 0x2ef   :  { %1397 = vtanh.f32 %v746_v59 }
 0x2f5   :  { %v1398_v5 = vpop.eup %1397 }
 0x2f6   :  { %v749_v10 = vmul.f32 %v1398_v5, %v748_v57 }
 0x2f8   :  { %v2477_v39 = vadd.f32 %v750_v62, %v749_v10 }
 0x2fa   :  { %776 = vmatmul.f32.vlgmr.msrb.gmra.mxu2 %v2477_v39  ;;  %796 = vmatmul.f32.vlgmr.msrb.gmra.mxu3 %v2477_v39 }
 0x2fb   :  { %816 = vmatmul.f32.vlgmr.msra.gmra.mxu0 %v2477_v39  ;;  %1032 = vmatpush.msrb.mxu2 %v2230_v27 }
 0x2fc   :  { %1108 = vmatpush.msrb.mxu3 %v2236_v0  ;;  %1128 = vmatpush.msra.mxu0 %v2242_v15  ;;  %v1480_v0 = vld [vmem:[%s2718_s2 + $0x50] sm:$0xff]  ;;  %v2530_v15 = vld [vmem:[%s2718_s2 + $0x40] sm:$0xff] }
 0x2fd   :  { %1033 = vmatpush.msrb.mxu2 %v2248_v8 }
 0x2fe   :  { %1109 = vmatpush.msrb.mxu3 %v2254_v11  ;;  %1129 = vmatpush.msra.mxu0 %v2260_v14  ;;  %v1482_v11 = vld [vmem:[%s2718_s2 + $0x38] sm:$0xff]  ;;  %v2540_v14 = vld [vmem:[%s2718_s2 + $0x28] sm:$0xff] }
 0x2ff   :  { %1034 = vmatpush.msrb.mxu2 %v2266_v19 }
 0x300   :  { %1110 = vmatpush.msrb.mxu3 %v2272_v20  ;;  %1130 = vmatpush.msra.mxu0 %v2278_v21  ;;  %v1484_v20 = vld [vmem:[%s2718_s2 + $0x20] sm:$0xff]  ;;  %v2550_v21 = vld [vmem:[%s2718_s2 + $0x10] sm:$0xff] }
 0x301   :  { %1035 = vmatpush.msrb.mxu2 %v2284_v22 }
 0x302   :  { %1111 = vmatpush.msrb.mxu3 %v2290_v23  ;;  %1131 = vmatpush.msra.mxu0 %v2296_v24  ;;  %v1486_v23 = vld [vmem:[%s2718_s2 + $0x8] sm:$0xff]  ;;  %v2806_v24 = vld [vmem:[#allocation30_spill] sm:$0xff] }
 0x303   :  { %1036 = vmatpush.msrb.mxu2 %v2302_v25 }
 0x304   :  { %1112 = vmatpush.msrb.mxu3 %v2308_v26  ;;  %1132 = vmatpush.msra.mxu0 %v2314_v28  ;;  %v162_v26 = vadd.f32 %v2806_v24, %v2799_v17  ;;  %v1235_v24 = vld [vmem:[%s2721_s5 + $0x38] sm:$0xff] }
 0x305   :  { %1037 = vmatpush.msrb.mxu2 %v2320_v29 }
 0x306   :  { %1113 = vmatpush.msrb.mxu3 %v2326_v31  ;;  %1133 = vmatpush.msra.mxu0 %v2332_v32  ;;  %v2807_v32 = vld [vmem:[#allocation22_spill] sm:$0xff] }
 0x307   :  { %1038 = vmatpush.msrb.mxu2 %v2338_v33 }
 0x308   :  { %1114 = vmatpush.msrb.mxu3 %v2344_v34  ;;  %1134 = vmatpush.msra.mxu0 %v2350_v35 }
 0x309   :  { %1039 = vmatpush.msrb.mxu2 %v2356_v36 }
 0x30a   :  { %1115 = vmatpush.msrb.mxu3 %v2362_v37  ;;  %1135 = vmatpush.msra.mxu0 %v2368_v38 }
 0x30b   :  { %1040 = vmatpush.msrb.mxu2 %v2374_v40 }
 0x30c   :  { %1116 = vmatpush.msrb.mxu3 %v2380_v41  ;;  %1136 = vmatpush.msra.mxu0 %v2386_v42 }
 0x30d   :  { %1041 = vmatpush.msrb.mxu2 %v2392_v44 }
 0x30e   :  { %1117 = vmatpush.msrb.mxu3 %v2398_v45  ;;  %1137 = vmatpush.msra.mxu0 %v2404_v46 }
 0x30f   :  { %1042 = vmatpush.msrb.mxu2 %v2410_v47 }
 0x310   :  { %1118 = vmatpush.msrb.mxu3 %v2416_v50  ;;  %1138 = vmatpush.msra.mxu0 %v1478_v51 }
 0x311   :  { %1043 = vmatpush.msrb.mxu2 %v2423_v53 }
 0x312   :  { %1119 = vmatpush.msrb.mxu3 %v2429_v58  ;;  %1139 = vmatpush.msra.mxu0 %v1479_v55 }
 0x313   :  { %1044 = vmatpush.msrb.mxu2 %v2436_v49 }
 0x314   :  { %1120 = vmatpush.msrb.mxu3 %v2442_v18  ;;  %1140 = vmatpush.msra.mxu0 %v1480_v0 }
 0x315   :  { %1045 = vmatpush.msrb.mxu2 %v2530_v15 }
 0x316   :  { %1121 = vmatpush.msrb.mxu3 %v2450_v52  ;;  %1141 = vmatpush.msra.mxu0 %v1482_v11 }
 0x317   :  { %1046 = vmatpush.msrb.mxu2 %v2540_v14 }
 0x318   :  { %1122 = vmatpush.msrb.mxu3 %v2458_v6  ;;  %1142 = vmatpush.msra.mxu0 %v1484_v20 }
 0x319   :  { %1047 = vmatpush.msrb.mxu2 %v2550_v21 }
 0x31a   :  { %1123 = vmatpush.msrb.mxu3 %v2466_v4  ;;  %1143 = vmatpush.msra.mxu0 %v1486_v23 }
 0x378   :  { %v817_v60 = vpop.f32.mrf.mxu0 }
 0x379   :  { %v860_v16 = vadd.f32 %v2082_v1, %v817_v60 }
 0x37d   :  { %v777_v28 = vpop.f32.mrf.mxu2  ;;  %v797_v31 = vpop.f32.mrf.mxu3 }
 0x37e   :  { %v820_v34 = vadd.f32 %v777_v28, %v2807_v32  ;;  %v840_v35 = vadd.f32 %v797_v31, %v162_v26  ;;  %v1234_v28 = vld [vmem:[%s2721_s5 + $0x30] sm:$0xff]  ;;  %v1233_v31 = vld [vmem:[%s2721_s5 + $0x28] sm:$0xff] }
 0x380   :  { %v1347_v37 = vmul.f32 -1.442695, %v820_v34  ;;  %v1348_v38 = vmul.f32 -1.442695, %v840_v35  ;;  %v1232_v34 = vld [vmem:[%s2721_s5 + $0x20] sm:$0xff] }
 0x382   :  { %1399 = vpow2.f32 %v1347_v37  ;;  %v1231_v37 = vld [vmem:[%s2721_s5 + $0x18] sm:$0xff] }
 0x383   :  { %1401 = vpow2.f32 %v1348_v38  ;;  %v1230_v38 = vld [vmem:[%s2721_s5 + $0x10] sm:$0xff] }
 0x388   :  { %v1400_v41 = vpop.eup %1399 }
 0x389   :  { %v1402_v42 = vpop.eup %1401  ;;  %v824_v45 = vadd.f32 1.0, %v1400_v41 }
 0x38a   :  { %v844_v46 = vadd.f32 1.0, %v1402_v42  ;;  %v1229_v42 = vld [vmem:[%s2721_s5 + $0x8] sm:$0xff] }
 0x38b   :  { %1403 = vrcp.f32 %v824_v45  ;;  %v836_v4 = vand.u32 2147483648, %v824_v45  ;;  %v834_v12 = vand.u32 2147483647, %v824_v45  ;;  %vm830_vm3 = vweird.f32 %v824_v45 }
 0x38c   :  { %1405 = vrcp.f32 %v844_v46  ;;  %v856_v57 = vand.u32 2147483648, %v844_v46  ;;  %vm850_vm7 = vweird.f32 %v844_v46  ;;  %v854_v5 = vand.u32 2147483647, %v844_v46 }
 0x38d   :  { %v837_v43 = vor.u32 1.1754944e-38, %v836_v4  ;;  %vm835_vm5 = vcmp.eq.f32.partialorder %v834_v12, 8.507059e+37 }
 0x38e   :  { %v857_v51 = vor.u32 1.1754944e-38, %v856_v57  ;;  %vm855_vm9 = vcmp.eq.f32.partialorder %v854_v5, 8.507059e+37 }
 0x391   :  { %v1404_v50 = vpop.eup %1403 }
 0x392   :  { %v1406_v58 = vpop.eup %1405  ;;  %v826_v18 = vmul.f32 %v1404_v50, %v824_v45  ;;  %vm831_vm2 = vweird.f32 %v1404_v50 }
 0x393   :  { %v846_v52 = vmul.f32 %v1406_v58, %v844_v46  ;;  %vm832_vm4 = vmor %vm830_vm3, %vm831_vm2  ;;  %vm851_vm6 = vweird.f32 %v1406_v58  ;;  %v1228_v46 = vld [vmem:[%s2721_s5] sm:$0xff] }
 0x394   :  { %v827_v6 = vsub.f32 1.0, %v826_v18  ;;  %vm852_vm8 = vmor %vm850_vm7, %vm851_vm6 }
 0x395   :  { %v847_v3 = vsub.f32 1.0, %v846_v52 }
 0x396   :  { %v828_v63 = vmul.f32 %v1404_v50, %v827_v6 }
 0x397   :  { %v848_v13 = vmul.f32 %v1406_v58, %v847_v3 }
 0x398   :  { %v829_v2 = vadd.f32 %v1404_v50, %v828_v63 }
 0x399   :  { %v849_v59 = vadd.f32 %v1406_v58, %v848_v13 }
 0x39a   :  { %v833_v48 = vsel %vm832_vm4, %v1404_v50, %v829_v2 }
 0x39b   :  { %v838_v54 = vsel %vm835_vm5, %v837_v43, %v833_v48  ;;  %v853_v62 = vsel %vm852_vm8, %v1406_v58, %v849_v59 }
 0x39c   :  { %v861_v7 = vmul.f32 %v860_v16, %v838_v54  ;;  %v858_v55 = vsel %vm855_vm9, %v857_v51, %v853_v62  ;;  %v2639_v16 = vld [vmem:[%s2719_s4] ss:$0 sm:$0xff]  ;;  %v2811_v54 = vld [vmem:[#allocation17_spill] sm:$0xff] }
 0x39d   :  { %v864_v1 = vsub.f32 1.0, %v858_v55  ;;  %v866_v20 = vmul.f32 %v858_v55, %v2477_v39  ;;  %v206_v59 = vadd.f32 %v2811_v54, %v2085_v61 }
 0x39e   :  { %v862_v10 = vadd.f32 %v861_v7, %v203_v30 }
 0x3a0   :  { %1407 = vtanh.f32 %v862_v10 }
 0x3a6   :  { %v1408_v0 = vpop.eup %1407 }
 0x3a7   :  { %v865_v11 = vmul.f32 %v1408_v0, %v864_v1 }
 0x3a9   :  { %v2564_v23 = vadd.f32 %v866_v20, %v865_v11 }
 0x3ab   :  { %892 = vmatmul.f32.vlgmr.msra.gmra.mxu1 %v2564_v23  ;;  %912 = vmatmul.f32.vlgmr.msra.gmra.mxu2 %v2564_v23 }
 0x3ac   :  { %932 = vmatmul.f32.vlgmr.msra.gmra.mxu3 %v2564_v23  ;;  %1148 = vmatpush.msra.mxu1 %v2230_v27  ;;  %v1243_v27 = vld [vmem:[%s2721_s5 + $0x78] sm:$0xff] }
 0x3ad   :  { %1248 = vmatpush.msra.mxu2 %v1243_v27 }
 0x3ae   :  { %1149 = vmatpush.msra.mxu1 %v2248_v8  ;;  %v1242_v8 = vld [vmem:[%s2721_s5 + $0x70] sm:$0xff] }
 0x3af   :  { %1249 = vmatpush.msra.mxu2 %v1242_v8 }
 0x3b0   :  { %1150 = vmatpush.msra.mxu1 %v2266_v19  ;;  %v1241_v19 = vld [vmem:[%s2721_s5 + $0x68] sm:$0xff] }
 0x3b1   :  { %1250 = vmatpush.msra.mxu2 %v1241_v19  ;;  %v2812_v19 = vld [vmem:[#allocation27_spill] sm:$0xff] }
 0x3b2   :  { %1151 = vmatpush.msra.mxu1 %v2284_v22  ;;  %v1240_v22 = vld [vmem:[%s2721_s5 + $0x60] sm:$0xff] }
 0x3b3   :  { %1251 = vmatpush.msra.mxu2 %v1240_v22  ;;  %v2813_v22 = vld [vmem:[#allocation16_spill] sm:$0xff] }
 0x3b4   :  { %1152 = vmatpush.msra.mxu1 %v2302_v25  ;;  %v1239_v25 = vld [vmem:[%s2721_s5 + $0x58] sm:$0xff] }
 0x3b5   :  { %1252 = vmatpush.msra.mxu2 %v1239_v25  ;;  %v2814_v25 = vld [vmem:[#allocation32_spill] sm:$0xff] }
 0x3b6   :  { %1153 = vmatpush.msra.mxu1 %v2320_v29 }
 0x3b8   :  { %1154 = vmatpush.msra.mxu1 %v2338_v33  ;;  %v2809_v33 = vld [vmem:[#allocation23_spill] sm:$0xff] }
 0x3ba   :  { %1155 = vmatpush.msra.mxu1 %v2356_v36 }
 0x3bc   :  { %1156 = vmatpush.msra.mxu1 %v2374_v40  ;;  %v1238_v40 = vld [vmem:[%s2721_s5 + $0x50] sm:$0xff] }
 0x3bd   :  { %1253 = vmatpush.msra.mxu2 %v1238_v40  ;;  %v2815_v40 = vld [vmem:[#allocation24_spill] sm:$0xff] }
 0x3be   :  { %1157 = vmatpush.msra.mxu1 %v2392_v44 }
 0x3c0   :  { %1158 = vmatpush.msra.mxu1 %v2410_v47  ;;  %v1237_v47 = vld [vmem:[%s2721_s5 + $0x48] sm:$0xff] }
 0x3c1   :  { %1254 = vmatpush.msra.mxu2 %v1237_v47 }
 0x3c2   :  { %1159 = vmatpush.msra.mxu1 %v2423_v53  ;;  %v2810_v53 = vld [vmem:[#allocation31_spill] sm:$0xff] }
 0x3c4   :  { %1160 = vmatpush.msra.mxu1 %v2436_v49  ;;  %v165_v49 = vadd.f32 %v2810_v53, %v2799_v17 }
 0x3c6   :  { %1161 = vmatpush.msra.mxu1 %v2530_v15  ;;  %v1236_v15 = vld [vmem:[%s2721_s5 + $0x40] sm:$0xff] }
 0x3c7   :  { %1255 = vmatpush.msra.mxu2 %v1236_v15 }
 0x3c8   :  { %1162 = vmatpush.msra.mxu1 %v2540_v14 }
 0x3c9   :  { %1256 = vmatpush.msra.mxu2 %v1235_v24 }
 0x3ca   :  { %1163 = vmatpush.msra.mxu1 %v2550_v21 }
 0x3cb   :  { %1257 = vmatpush.msra.mxu2 %v1234_v28 }
 0x3cd   :  { %1258 = vmatpush.msra.mxu2 %v1233_v31 }
 0x3cf   :  { %1259 = vmatpush.msra.mxu2 %v1232_v34 }
 0x3d1   :  { %1260 = vmatpush.msra.mxu2 %v1231_v37 }
 0x3d3   :  { %1261 = vmatpush.msra.mxu2 %v1230_v38 }
 0x3d5   :  { %1262 = vmatpush.msra.mxu2 %v1229_v42 }
 0x3d7   :  { %1263 = vmatpush.msra.mxu2 %v1228_v46 }
 0x428   :  { %v893_v29 = vpop.f32.mrf.mxu1 }
 0x429   :  { %v936_v36 = vadd.f32 %v893_v29, %v2809_v33  ;;  %v168_v29 = vadd.f32 %v2814_v25, %v2799_v17 }
 0x42b   :  { %v1349_v44 = vmul.f32 -1.442695, %v936_v36 }
 0x42d   :  { %1409 = vpow2.f32 %v1349_v44 }
 0x42e   :  { %v913_v14 = vpop.f32.mrf.mxu2 }
 0x42f   :  { %v956_v21 = vadd.f32 %v913_v14, %v165_v49  ;;  %v933_v63 = vpop.f32.mrf.mxu3 }
 0x430   :  { %v976_v48 = vadd.f32 %v2639_v16, %v933_v63  ;;  %v2816_v63 = vld [vmem:[#allocation19_spill] sm:$0xff] }
 0x431   :  { %v1350_v26 = vmul.f32 -1.442695, %v956_v21 }
 0x433   :  { %v1410_v32 = vpop.eup %1409  ;;  %1411 = vpow2.f32 %v1350_v26 }
 0x434   :  { %v940_v35 = vadd.f32 1.0, %v1410_v32 }
 0x436   :  { %1413 = vrcp.f32 %v940_v35  ;;  %v952_v52 = vand.u32 2147483648, %v940_v35  ;;  %v950_v4 = vand.u32 2147483647, %v940_v35  ;;  %vm946_vm11 = vweird.f32 %v940_v35 }
 0x438   :  { %v953_v13 = vor.u32 1.1754944e-38, %v952_v52  ;;  %vm951_vm13 = vcmp.eq.f32.partialorder %v950_v4, 8.507059e+37 }
 0x439   :  { %v1412_v41 = vpop.eup %1411 }
 0x43a   :  { %v960_v45 = vadd.f32 1.0, %v1412_v41 }
 0x43c   :  { %v1414_v50 = vpop.eup %1413  ;;  %1415 = vrcp.f32 %v960_v45  ;;  %v972_v7 = vand.u32 2147483648, %v960_v45  ;;  %v970_v5 = vand.u32 2147483647, %v960_v45  ;;  %vm966_vm15 = vweird.f32 %v960_v45 }
 0x43d   :  { %v942_v58 = vmul.f32 %v1414_v50, %v940_v35  ;;  %vm947_vm10 = vweird.f32 %v1414_v50 }
 0x43e   :  { %vm948_vm12 = vmor %vm946_vm11, %vm947_vm10  ;;  %v973_v51 = vor.u32 1.1754944e-38, %v972_v7  ;;  %vm971_vm1 = vcmp.eq.f32.partialorder %v970_v5, 8.507059e+37 }
 0x43f   :  { %v943_v18 = vsub.f32 1.0, %v942_v58 }
 0x441   :  { %v944_v6 = vmul.f32 %v1414_v50, %v943_v18 }
 0x442   :  { %v1416_v3 = vpop.eup %1415 }
 0x443   :  { %v962_v12 = vmul.f32 %v1416_v3, %v960_v45  ;;  %v945_v60 = vadd.f32 %v1414_v50, %v944_v6  ;;  %vm967_vm14 = vweird.f32 %v1416_v3 }
 0x444   :  { %vm968_vm0 = vmor %vm966_vm15, %vm967_vm14 }
 0x445   :  { %v963_v2 = vsub.f32 1.0, %v962_v12  ;;  %v949_v43 = vsel %vm948_vm12, %v1414_v50, %v945_v60  ;;  %v209_v12 = vadd.f32 %v2816_v63, %v2085_v61 }
 0x446   :  { %v954_v9 = vsel %vm951_vm13, %v953_v13, %v949_v43 }
 0x447   :  { %v964_v30 = vmul.f32 %v1416_v3, %v963_v2  ;;  %v977_v57 = vmul.f32 %v976_v48, %v954_v9 }
 0x449   :  { %v965_v10 = vadd.f32 %v1416_v3, %v964_v30  ;;  %v978_v62 = vadd.f32 %v977_v57, %v206_v59 }
 0x44b   :  { %v969_v55 = vsel %vm968_vm0, %v1416_v3, %v965_v10  ;;  %1417 = vtanh.f32 %v978_v62 }
 0x44c   :  { %v974_v1 = vsel %vm971_vm1, %v973_v51, %v969_v55 }
 0x44d   :  { %v980_v0 = vsub.f32 1.0, %v974_v1  ;;  %v982_v27 = vmul.f32 %v974_v1, %v2564_v23 }
 0x451   :  { %v1418_v11 = vpop.eup %1417 }
 0x452   :  { %v981_v20 = vmul.f32 %v1418_v11, %v980_v0 }
 0x454   :  { %v2645_v8 = vadd.f32 %v982_v27, %v981_v20  ;;  %v2817_v27 = vld [vmem:[#allocation34_spill] sm:$0xff] }
 0x456   :  { %1008 = vmatmul.f32.vlgmr.msrb.gmra.mxu0 %v2645_v8  ;;  %1028 = vmatmul.f32.vlgmr.msrb.gmra.mxu1 %v2645_v8 }
 0x457   :  { %1048 = vmatmul.f32.vlgmr.msrb.gmra.mxu2 %v2645_v8 }
 0x45f   :  { %1264 = vmatmul.f32.vlgmr.msra.gmra.mxu2 %v2812_v19 }
 0x467   :  { %1267 = vmatmul.f32.gmra.mxu2 %v2813_v22 }
 0x46f   :  { %1270 = vmatmul.f32.gmra.mxu2 %v2222_v56 }
 0x477   :  { %1273 = vmatmul.f32.gmra.mxu2 %v2477_v39 }
 0x47f   :  { %1276 = vmatmul.f32.gmra.mxu2 %v2564_v23  ;;  %v2662_v23 = vld [vmem:[%s2722_s6] ss:$0 sm:$0xff] }
 0x487   :  { %1279 = vmatmul.f32.gmra.mxu2 %v2645_v8 }
 0x4d3   :  { %v1009_v33 = vpop.f32.mrf.mxu0  ;;  %v1029_v36 = vpop.f32.mrf.mxu1 }
 0x4d4   :  { %v1052_v44 = vadd.f32 %v1009_v33, %v2815_v40  ;;  %v1072_v47 = vadd.f32 %v1029_v36, %v168_v29  ;;  %v2818_v33 = vld [vmem:[#allocation25_spill] sm:$0xff] }
 0x4d6   :  { %v1351_v53 = vmul.f32 -1.442695, %v1052_v44  ;;  %v1352_v49 = vmul.f32 -1.442695, %v1072_v47 }
 0x4d8   :  { %1419 = vpow2.f32 %v1351_v53 }
 0x4d9   :  { %1421 = vpow2.f32 %v1352_v49 }
 0x4da   :  { %v1049_v15 = vpop.f32.mrf.mxu2 }
 0x4db   :  { %v1092_v6 = vadd.f32 %v2639_v16, %v1049_v15 }
 0x4de   :  { %v1420_v56 = vpop.eup %1419 }
 0x4df   :  { %v1422_v14 = vpop.eup %1421  ;;  %v1056_v39 = vadd.f32 1.0, %v1420_v56 }
 0x4e0   :  { %v1076_v21 = vadd.f32 1.0, %v1422_v14 }
 0x4e1   :  { %1423 = vrcp.f32 %v1056_v39  ;;  %v1068_v41 = vand.u32 2147483648, %v1056_v39  ;;  %v1066_v46 = vand.u32 2147483647, %v1056_v39  ;;  %vm1062_vm3 = vweird.f32 %v1056_v39 }
 0x4e2   :  { %1425 = vrcp.f32 %v1076_v21  ;;  %v1265_v24 = vpop.f32.mrf.mxu2  ;;  %v1088_v60 = vand.u32 2147483648, %v1076_v21  ;;  %vm1082_vm7 = vweird.f32 %v1076_v21  ;;  %v1086_v43 = vand.u32 2147483647, %v1076_v21 }
 0x4e3   :  { %v1266_v26 = vadd.f32 %v2662_v23, %v1265_v24  ;;  %v1069_v18 = vor.u32 1.1754944e-38, %v1068_v41  ;;  %vm1067_vm5 = vcmp.eq.f32.partialorder %v1066_v46, 8.507059e+37 }
 0x4e4   :  { %v1089_v9 = vor.u32 1.1754944e-38, %v1088_v60  ;;  %vm1087_vm9 = vcmp.eq.f32.partialorder %v1086_v43, 8.507059e+37 }
 0x4e5   :  { %1289 = vst [vmem:[%s2723_s7] sm:$0xff] %v1266_v26 }
 0x4e7   :  { %v1424_v28 = vpop.eup %1423 }
 0x4e8   :  { %v1426_v31 = vpop.eup %1425  ;;  %v1058_v32 = vmul.f32 %v1424_v28, %v1056_v39  ;;  %vm1063_vm2 = vweird.f32 %v1424_v28 }
 0x4e9   :  { %v1078_v34 = vmul.f32 %v1426_v31, %v1076_v21  ;;  %vm1064_vm4 = vmor %vm1062_vm3, %vm1063_vm2  ;;  %vm1083_vm6 = vweird.f32 %v1426_v31 }
 0x4ea   :  { %v1059_v35 = vsub.f32 1.0, %v1058_v32  ;;  %v1268_v37 = vpop.f32.mrf.mxu2  ;;  %vm1084_vm8 = vmor %vm1082_vm7, %vm1083_vm6 }
 0x4eb   :  { %v1079_v38 = vsub.f32 1.0, %v1078_v34  ;;  %v1269_v42 = vadd.f32 %v2662_v23, %v1268_v37 }
 0x4ec   :  { %v1060_v45 = vmul.f32 %v1424_v28, %v1059_v35 }
 0x4ed   :  { %v1080_v50 = vmul.f32 %v1426_v31, %v1079_v38  ;;  %1290 = vst [vmem:[%s2723_s7 + $0x8] sm:$0xff] %v1269_v42 }
 0x4ee   :  { %v1061_v58 = vadd.f32 %v1424_v28, %v1060_v45 }
 0x4ef   :  { %v1081_v4 = vadd.f32 %v1426_v31, %v1080_v50  ;;  %v2819_v50 = vld [vmem:[#allocation21_spill] sm:$0xff] }
 0x4f0   :  { %v1065_v52 = vsel %vm1064_vm4, %v1424_v28, %v1061_v58  ;;  %v212_v58 = vadd.f32 %v2819_v50, %v2085_v61 }
 0x4f1   :  { %v1070_v3 = vsel %vm1067_vm5, %v1069_v18, %v1065_v52  ;;  %v1085_v59 = vsel %vm1084_vm8, %v1426_v31, %v1081_v4 }
 0x4f2   :  { %v1093_v13 = vmul.f32 %v1092_v6, %v1070_v3  ;;  %v1271_v2 = vpop.f32.mrf.mxu2  ;;  %v1090_v30 = vsel %vm1087_vm9, %v1089_v9, %v1085_v59 }
 0x4f3   :  { %v1272_v48 = vadd.f32 %v2662_v23, %v1271_v2  ;;  %v1096_v57 = vsub.f32 1.0, %v1090_v30  ;;  %v1098_v51 = vmul.f32 %v1090_v30, %v2645_v8  ;;  %v171_v8 = vadd.f32 %v2817_v27, %v2799_v17 }
 0x4f4   :  { %v1094_v54 = vadd.f32 %v1093_v13, %v209_v12 }
 0x4f5   :  { %1291 = vst [vmem:[%s2723_s7 + $0x10] sm:$0xff] %v1272_v48 }
 0x4f6   :  { %1427 = vtanh.f32 %v1094_v54 }
 0x4fa   :  { %v1274_v7 = vpop.f32.mrf.mxu2 }
 0x4fb   :  { %v1275_v5 = vadd.f32 %v2662_v23, %v1274_v7 }
 0x4fc   :  { %v1428_v10 = vpop.eup %1427 }
 0x4fd   :  { %v1097_v62 = vmul.f32 %v1428_v10, %v1096_v57  ;;  %1292 = vst [vmem:[%s2723_s7 + $0x18] sm:$0xff] %v1275_v5 }
 0x4ff   :  { %v2684_v55 = vadd.f32 %v1098_v51, %v1097_v62 }
 0x501   :  { %1124 = vmatmul.f32.vlgmr.msrb.gmra.mxu3 %v2684_v55  ;;  %1144 = vmatmul.f32.vlgmr.msra.gmra.mxu0 %v2684_v55 }
 0x502   :  { %1164 = vmatmul.f32.vlgmr.msra.gmra.mxu1 %v2684_v55  ;;  %v1277_v1 = vpop.f32.mrf.mxu2  ;;  %1282 = vmatmul.f32.gmra.mxu2 %v2684_v55 }
 0x503   :  { %v1278_v0 = vadd.f32 %v2662_v23, %v1277_v1 }
 0x505   :  { %1293 = vst [vmem:[%s2723_s7 + $0x20] sm:$0xff] %v1278_v0 }
 0x50a   :  { %v1280_v11 = vpop.f32.mrf.mxu2 }
 0x50b   :  { %v1281_v20 = vadd.f32 %v2662_v23, %v1280_v11 }
 0x50d   :  { %1294 = vst [vmem:[%s2723_s7 + $0x28] sm:$0xff] %v1281_v20 }
 0x57e   :  { %v1145_v19 = vpop.f32.mrf.mxu0 }
 0x57f   :  { %v1188_v22 = vadd.f32 %v1145_v19, %v171_v8  ;;  %v1165_v34 = vpop.f32.mrf.mxu1 }
 0x580   :  { %v1208_v41 = vadd.f32 %v2639_v16, %v1165_v34 }
 0x581   :  { %v1354_v25 = vmul.f32 -1.442695, %v1188_v22 }
 0x583   :  { %1429 = vpow2.f32 %v1354_v25 }
 0x584   :  { %v1125_v29 = vpop.f32.mrf.mxu3 }
 0x585   :  { %v1168_v36 = vadd.f32 %v1125_v29, %v2818_v33  ;;  %v1283_v40 = vpop.f32.mrf.mxu2 }
 0x586   :  { %v1284_v44 = vadd.f32 %v2662_v23, %v1283_v40 }
 0x587   :  { %v1353_v47 = vmul.f32 -1.442695, %v1168_v36 }
 0x588   :  { %1295 = vst [vmem:[%s2723_s7 + $0x30] sm:$0xff] %v1284_v44 }
 0x589   :  { %v1430_v53 = vpop.eup %1429  ;;  %1431 = vpow2.f32 %v1353_v47 }
 0x58a   :  { %v1192_v49 = vadd.f32 1.0, %v1430_v53 }
 0x58c   :  { %1433 = vrcp.f32 %v1192_v49  ;;  %v1204_v18 = vand.u32 2147483648, %v1192_v49  ;;  %vm1198_vm15 = vweird.f32 %v1192_v49  ;;  %v1202_v6 = vand.u32 2147483647, %v1192_v49 }
 0x58e   :  { %v1205_v63 = vor.u32 1.1754944e-38, %v1204_v18  ;;  %vm1203_vm1 = vcmp.eq.f32.partialorder %v1202_v6, 8.507059e+37 }
 0x58f   :  { %v1432_v17 = vpop.eup %1431 }
 0x590   :  { %v1172_v15 = vadd.f32 1.0, %v1432_v17 }
 0x592   :  { %1435 = vrcp.f32 %v1172_v15  ;;  %v1434_v56 = vpop.eup %1433  ;;  %v1184_v28 = vand.u32 2147483648, %v1172_v15  ;;  %v1182_v32 = vand.u32 2147483647, %v1172_v15  ;;  %vm1178_vm11 = vweird.f32 %v1172_v15 }
 0x593   :  { %v1194_v14 = vmul.f32 %v1434_v56, %v1192_v49  ;;  %vm1199_vm14 = vweird.f32 %v1434_v56 }
 0x594   :  { %v1185_v38 = vor.u32 1.1754944e-38, %v1184_v28  ;;  %vm1183_vm13 = vcmp.eq.f32.partialorder %v1182_v32, 8.507059e+37  ;;  %vm1200_vm0 = vmor %vm1198_vm15, %vm1199_vm14 }
 0x595   :  { %v1195_v24 = vsub.f32 1.0, %v1194_v14 }
 0x597   :  { %v1196_v35 = vmul.f32 %v1434_v56, %v1195_v24 }
 0x598   :  { %v1436_v39 = vpop.eup %1435 }
 0x599   :  { %v1174_v21 = vmul.f32 %v1436_v39, %v1172_v15  ;;  %vm1179_vm10 = vweird.f32 %v1436_v39  ;;  %v1197_v46 = vadd.f32 %v1434_v56, %v1196_v35 }
 0x59a   :  { %vm1180_vm12 = vmor %vm1178_vm11, %vm1179_vm10 }
 0x59b   :  { %v1175_v26 = vsub.f32 1.0, %v1174_v21  ;;  %v1201_v3 = vsel %vm1200_vm0, %v1434_v56, %v1197_v46 }
 0x59c   :  { %v1206_v12 = vsel %vm1203_vm1, %v1205_v63, %v1201_v3 }
 0x59d   :  { %v1176_v31 = vmul.f32 %v1436_v39, %v1175_v26  ;;  %v1212_v16 = vsub.f32 1.0, %v1206_v12  ;;  %v1214_v2 = vmul.f32 %v1206_v12, %v2684_v55 }
 0x59f   :  { %v1177_v37 = vadd.f32 %v1436_v39, %v1176_v31 }
 0x5a1   :  { %v1181_v42 = vsel %vm1180_vm12, %v1436_v39, %v1177_v37 }
 0x5a2   :  { %v1186_v45 = vsel %vm1183_vm13, %v1185_v38, %v1181_v42 }
 0x5a3   :  { %v1209_v52 = vmul.f32 %v1208_v41, %v1186_v45 }
 0x5a5   :  { %v1210_v4 = vadd.f32 %v1209_v52, %v212_v58 }
 0x5a7   :  { %1437 = vtanh.f32 %v1210_v4 }
 0x5ad   :  { %v1438_v60 = vpop.eup %1437 }
 0x5ae   :  { %v1213_v13 = vmul.f32 %v1438_v60, %v1212_v16 }
 0x5b0   :  { %v1215_v43 = vadd.f32 %v1214_v2, %v1213_v13 }
 0x5b2   :  { %1219 = vst [vmem:[%s2724_s8] sm:$0xff] %v1215_v43  ;;  %1285 = vmatmul.f32.gmra.mxu2 %v1215_v43 }
 0x635   :  { %v1286_v61 = vpop.f32.mrf.mxu2 }
 0x636   :  { %v1287_v48 = vadd.f32 %v2662_v23, %v1286_v61 }
 0x638   :  { %1296 = vst [vmem:[%s2723_s7 + $0x38] sm:$0xff] %v1287_v48 }

</bundles_post_ra>
